<compile_context>
chip_gen: v5e
topology: v5e:2x2
jax: 0.10.0
libtpu: 0.0.40
codegen_flags: <defaults>
</compile_context>

<pallas_src>
import numpy as np
import jax
import jax.numpy as jnp
from jax.experimental import pallas as pl
from jax.experimental.pallas import tpu as pltpu


def channel_multibranch_kernel(x_ref, w1_ref, w2_ref, g_ref, b_ref,
                               ff_hbm_ref, out_ref, sem):
    f32 = jnp.float32
    tb = x_ref.shape[0]

    # ---- passthrough branch: DMA ff_att[b0:b0+tb] straight into out[:, 1] ----
    b0 = pl.multiple_of(pl.program_id(0) * tb, tb)
    cp = pltpu.make_async_copy(ff_hbm_ref.at[pl.ds(b0, tb)], out_ref.at[:, 1], sem)
    cp.start()

    x = x_ref[...].astype(f32)                                   # (TB, N, D)

    # ---- SEPerceptron: squeeze (token mean) -> FC -> ReLU -> FC -> sigmoid ----
    pooled = jnp.mean(x, axis=1)                                 # (TB, D)
    h = jnp.dot(pooled, w1_ref[...], preferred_element_type=f32)  # (TB, R)
    h = jnp.maximum(h, 0.0)
    s = jax.nn.sigmoid(jnp.dot(h, w2_ref[...], preferred_element_type=f32))  # (TB, D)

    # residual + channel rescale (dropout3 is identity in eval mode)
    y = x + x * s[:, None, :]                                    # (TB, N, D)

    # ---- LayerNorm over channels (f32 statistics, eps = 1e-5) ----
    mu = jnp.mean(y, axis=-1, keepdims=True)
    var = jnp.mean(jnp.square(y - mu), axis=-1, keepdims=True)
    att3 = (y - mu) * jax.lax.rsqrt(var + 1e-5) * g_ref[...] + b_ref[...]

    out_ref[:, 0] = att3.astype(out_ref.dtype)
    cp.wait()


def _pick_tb(batch, max_tb=32):
    """Largest divisor of `batch` <= max_tb that still leaves >= 2 grid steps."""
    best = 1
    for d in range(1, min(batch, max_tb) + 1):
        if batch % d == 0 and (batch // d >= 2 or batch == 1):
            best = d
    return best


def channel_multi_branch(x, ff_att, params, tb=None):
    B, n, D = x.shape
    assert ff_att.shape == x.shape
    if tb is None:
        tb = _pick_tb(B)
    assert B % tb == 0
    grid = (B // tb,)

    weights = (params["w1_t"], params["w2_t"], params["g"], params["b"])

    def _full_spec(arr):
        nd = arr.ndim
        return pl.BlockSpec(arr.shape, lambda i, _nd=nd: (0,) * _nd)

    in_specs = [pl.BlockSpec((tb, n, D), lambda i: (i, 0, 0))]
    in_specs += [_full_spec(w) for w in weights]
    in_specs += [pl.BlockSpec(memory_space=pl.ANY)]      # ff_att stays in HBM
    out_spec = pl.BlockSpec((tb, 2, n, D), lambda i: (i, 0, 0, 0))

    itemsize = jnp.dtype(x.dtype).itemsize
    R = params["w1_t"].shape[1]
    cost = pl.CostEstimate(
        flops=int(B * (4 * D * R + 14 * n * D)),
        transcendentals=int(B * D + B * n),
        bytes_accessed=int(4 * B * n * D * itemsize
                           + sum(int(np.prod(w.shape)) * 4 for w in weights)),
    )

    return pl.pallas_call(
        channel_multibranch_kernel,
        out_shape=jax.ShapeDtypeStruct((B, 2, n, D), x.dtype),
        grid=grid,
        in_specs=in_specs,
        out_specs=out_spec,
        scratch_shapes=[pltpu.SemaphoreType.DMA(())],
        compiler_params=pltpu.CompilerParams(dimension_semantics=("parallel",)),
        cost_estimate=cost,
    )(x, *weights, ff_att)


def init_params(key, D, reduction=16):
    R = max(D // reduction, 1)
    k1, k2, k3, k4 = jax.random.split(key, 4)
    nrm = lambda k, shape, s: (s * jax.random.normal(k, shape)).astype(jnp.float32)
    # nn.Linear(D, R) / nn.Linear(R, D) weights (bias=False, classic SE block)
    W1 = nrm(k1, (R, D), 1.0 / np.sqrt(D))
    W2 = nrm(k2, (D, R), 1.0 / np.sqrt(R))
    # LayerNorm(d_model)
    g = (1.0 + nrm(k3, (D,), 0.1)).astype(jnp.float32)
    b = nrm(k4, (D,), 0.1)

    raw = dict(W1=W1, W2=W2, g=g, b=b)
    params = dict(w1_t=W1.T, w2_t=W2.T, g=g.reshape(1, D), b=b.reshape(1, D))
    return params, raw


def reference(x, ff_att, raw, eps=1e-5):
    """Pure-JAX reference built directly from the module-form parameters."""
    pooled = jnp.mean(x, axis=1)
    h = jax.nn.relu(pooled @ raw["W1"].T)
    s = jax.nn.sigmoid(h @ raw["W2"].T)
    y = x + x * s[:, None, :]
    mu = jnp.mean(y, axis=-1, keepdims=True)
    var = jnp.mean(jnp.square(y - mu), axis=-1, keepdims=True)
    att3 = (y - mu) * jax.lax.rsqrt(var + eps) * raw["g"] + raw["b"]
    return jnp.stack([att3, ff_att], axis=1)


if __name__ == "__main__":
    key = jax.random.PRNGKey(0)
    kx, kf, kp = jax.random.split(key, 3)

    B, N, D = 8, 64, 256                    # small d_model, 64 tokens
    x = jax.random.normal(kx, (B, N, D), dtype=jnp.float32)
    ff_att = jax.random.normal(kf, (B, N, D), dtype=jnp.float32)
    params, raw = init_params(kp, D)

    out = channel_multi_branch(x, ff_att, params)
    out = jax.block_until_ready(out)

    ref = jax.block_until_ready(reference(x, ff_att, raw))
    assert out.shape == (B, 2, N, D)
    np.testing.assert_allclose(np.asarray(out), np.asarray(ref), rtol=2e-2, atol=2e-2)
    print("KERNEL_OK")
</pallas_src>

<mosaic_0001>
module attributes {stable_mosaic.version = 11 : i64} {
  func.func @channel_multibranch_kernel(%arg0: i32, %arg1: memref<4x64x256xf32, #tpu.memory_space<vmem>>, %arg2: memref<256x16xf32, #tpu.memory_space<vmem>>, %arg3: memref<16x256xf32, #tpu.memory_space<vmem>>, %arg4: memref<1x256xf32, #tpu.memory_space<vmem>>, %arg5: memref<1x256xf32, #tpu.memory_space<vmem>>, %arg6: memref<8x64x256xf32, #tpu.memory_space<any>>, %arg7: memref<4x2x64x256xf32, #tpu.memory_space<vmem>>, %arg8: memref<!tpu.dma_semaphore, #tpu.memory_space<semaphore_mem>>) attributes {dimension_semantics = [#tpu.dimension_semantics<parallel>], iteration_bounds = array<i64: 2>, scalar_prefetch = 0 : i64, scratch_operands = 1 : i64, tpu.core_type = #tpu.core_type<tc>, window_params = [{transform_indices = @transform_0, window_bounds = array<i64: 4, 64, 256>}, {pipeline_mode = #tpu.pipeline_mode<synchronous>, transform_indices = @transform_1, window_bounds = array<i64: 256, 16>}, {pipeline_mode = #tpu.pipeline_mode<synchronous>, transform_indices = @transform_2, window_bounds = array<i64: 16, 256>}, {pipeline_mode = #tpu.pipeline_mode<synchronous>, transform_indices = @transform_3, window_bounds = array<i64: 1, 256>}, {pipeline_mode = #tpu.pipeline_mode<synchronous>, transform_indices = @transform_4, window_bounds = array<i64: 1, 256>}, {}, {transform_indices = @transform_6, window_bounds = array<i64: 4, 2, 64, 256>}]} {
    %c4_i32 = arith.constant 4 : i32
    %0 = arith.muli %arg0, %c4_i32 : i32
    %1 = tpu.assume_multiple %0, 4 : i32
    %c1_i32 = arith.constant 1 : i32
    %c0_i32 = arith.constant 0 : i32
    %c0_i32_0 = arith.constant 0 : i32
    %2 = tpu.memref_slice %arg6[%1, %c0_i32, %c0_i32_0] : memref<8x64x256xf32, #tpu.memory_space<any>> -> memref<4x64x256xf32, #tpu.memory_space<any>>
    %c0_i32_1 = arith.constant 0 : i32
    %c0_i32_2 = arith.constant 0 : i32
    %c0_i32_3 = arith.constant 0 : i32
    %3 = tpu.memref_slice %arg7[%c0_i32_1, %c1_i32, %c0_i32_2, %c0_i32_3] : memref<4x2x64x256xf32, #tpu.memory_space<vmem>> -> memref<4x1x64x256xf32, #tpu.memory_space<vmem>>
    %4 = tpu.memref_squeeze %3 : memref<4x1x64x256xf32, #tpu.memory_space<vmem>> -> memref<4x64x256xf32, #tpu.memory_space<vmem>>
    tpu.enqueue_dma source(%2 : memref<4x64x256xf32, #tpu.memory_space<any>>) target(%4 : memref<4x64x256xf32, #tpu.memory_space<vmem>>) target_semaphore(%arg8 : memref<!tpu.dma_semaphore, #tpu.memory_space<semaphore_mem>>)
    %c0 = arith.constant 0 : index
    %c0_4 = arith.constant 0 : index
    %c0_5 = arith.constant 0 : index
    %5 = vector.load %arg1[%c0, %c0_4, %c0_5] : memref<4x64x256xf32, #tpu.memory_space<vmem>>, vector<4x64x256xf32>
    %cst = arith.constant dense<0.000000e+00> : vector<4x256xf32>
    %6 = vector.multi_reduction <add>, %5, %cst [1] : vector<4x64x256xf32> to vector<4x256xf32>
    %cst_6 = arith.constant 6.400000e+01 : f32
    %7 = vector.broadcast %cst_6 : f32 to vector<4x256xf32>
    %8 = arith.divf %6, %7 : vector<4x256xf32>
    %c0_7 = arith.constant 0 : index
    %c0_8 = arith.constant 0 : index
    %9 = vector.load %arg2[%c0_7, %c0_8] : memref<256x16xf32, #tpu.memory_space<vmem>>, vector<256x16xf32>
    %cst_9 = arith.constant dense<0.000000e+00> : vector<4x16xf32>
    %10 = tpu.matmul %8, %9, %cst_9 {dimension_numbers = #tpu.dot_dimension_numbers<[1], [0], [0], [1], [0, 0, 1, 1], [], []>} : vector<4x256xf32>, vector<256x16xf32>, vector<4x16xf32> -> vector<4x16xf32>
    %cst_10 = arith.constant 0.000000e+00 : f32
    %11 = vector.broadcast %cst_10 : f32 to vector<4x16xf32>
    %12 = arith.maximumf %10, %11 : vector<4x16xf32>
    %c0_11 = arith.constant 0 : index
    %c0_12 = arith.constant 0 : index
    %13 = vector.load %arg3[%c0_11, %c0_12] : memref<16x256xf32, #tpu.memory_space<vmem>>, vector<16x256xf32>
    %cst_13 = arith.constant dense<0.000000e+00> : vector<4x256xf32>
    %14 = tpu.matmul %12, %13, %cst_13 {dimension_numbers = #tpu.dot_dimension_numbers<[1], [0], [0], [1], [0, 0, 1, 1], [], []>} : vector<4x16xf32>, vector<16x256xf32>, vector<4x256xf32> -> vector<4x256xf32>
    %15 = arith.negf %14 : vector<4x256xf32>
    %16 = math.exp %15 : vector<4x256xf32>
    %cst_14 = arith.constant 1.000000e+00 : f32
    %17 = vector.broadcast %cst_14 : f32 to vector<4x256xf32>
    %18 = arith.addf %17, %16 : vector<4x256xf32>
    %19 = arith.divf %17, %18 : vector<4x256xf32>
    %20 = vector.shape_cast %19 : vector<4x256xf32> to vector<4x1x256xf32>
    %21 = vector.broadcast %20 : vector<4x1x256xf32> to vector<4x64x256xf32>
    %22 = arith.mulf %5, %21 : vector<4x64x256xf32>
    %23 = arith.addf %5, %22 : vector<4x64x256xf32>
    %cst_15 = arith.constant dense<0.000000e+00> : vector<4x64xf32>
    %24 = vector.multi_reduction <add>, %23, %cst_15 [2] : vector<4x64x256xf32> to vector<4x64xf32>
    %25 = vector.shape_cast %24 : vector<4x64xf32> to vector<4x64x1xf32>
    %cst_16 = arith.constant 2.560000e+02 : f32
    %26 = vector.broadcast %cst_16 : f32 to vector<4x64x1xf32>
    %27 = arith.divf %25, %26 : vector<4x64x1xf32>
    %28 = vector.broadcast %27 : vector<4x64x1xf32> to vector<4x64x256xf32>
    %29 = arith.subf %23, %28 : vector<4x64x256xf32>
    %30 = arith.mulf %29, %29 : vector<4x64x256xf32>
    %cst_17 = arith.constant dense<0.000000e+00> : vector<4x64xf32>
    %31 = vector.multi_reduction <add>, %30, %cst_17 [2] : vector<4x64x256xf32> to vector<4x64xf32>
    %32 = vector.shape_cast %31 : vector<4x64xf32> to vector<4x64x1xf32>
    %cst_18 = arith.constant 2.560000e+02 : f32
    %33 = vector.broadcast %cst_18 : f32 to vector<4x64x1xf32>
    %34 = arith.divf %32, %33 : vector<4x64x1xf32>
    %35 = vector.broadcast %27 : vector<4x64x1xf32> to vector<4x64x256xf32>
    %36 = arith.subf %23, %35 : vector<4x64x256xf32>
    %cst_19 = arith.constant 9.99999974E-6 : f32
    %37 = vector.broadcast %cst_19 : f32 to vector<4x64x1xf32>
    %38 = arith.addf %34, %37 : vector<4x64x1xf32>
    %39 = math.rsqrt %38 : vector<4x64x1xf32>
    %40 = vector.broadcast %39 : vector<4x64x1xf32> to vector<4x64x256xf32>
    %41 = arith.mulf %36, %40 : vector<4x64x256xf32>
    %c0_20 = arith.constant 0 : index
    %c0_21 = arith.constant 0 : index
    %42 = vector.load %arg4[%c0_20, %c0_21] : memref<1x256xf32, #tpu.memory_space<vmem>>, vector<1x256xf32>
    %43 = vector.shape_cast %42 : vector<1x256xf32> to vector<1x1x256xf32>
    %44 = vector.broadcast %43 : vector<1x1x256xf32> to vector<4x64x256xf32>
    %45 = arith.mulf %41, %44 : vector<4x64x256xf32>
    %c0_22 = arith.constant 0 : index
    %c0_23 = arith.constant 0 : index
    %46 = vector.load %arg5[%c0_22, %c0_23] : memref<1x256xf32, #tpu.memory_space<vmem>>, vector<1x256xf32>
    %47 = vector.shape_cast %46 : vector<1x256xf32> to vector<1x1x256xf32>
    %48 = vector.broadcast %47 : vector<1x1x256xf32> to vector<4x64x256xf32>
    %49 = arith.addf %45, %48 : vector<4x64x256xf32>
    %c0_24 = arith.constant 0 : index
    %c0_25 = arith.constant 0 : index
    %c0_26 = arith.constant 0 : index
    %c0_27 = arith.constant 0 : index
    %50 = vector.load %arg7[%c0_24, %c0_25, %c0_26, %c0_27] : memref<4x2x64x256xf32, #tpu.memory_space<vmem>>, vector<4x1x64x256xf32>
    %51 = vector.shape_cast %50 : vector<4x1x64x256xf32> to vector<4x64x256xf32>
    %52 = vector.shape_cast %49 : vector<4x64x256xf32> to vector<4x1x64x256xf32>
    tpu.vector_store %arg7[%c0_24, %c0_25, %c0_26, %c0_27], %52 {strides = array<i32>} : memref<4x2x64x256xf32, #tpu.memory_space<vmem>>, vector<4x1x64x256xf32>,
    %c1_i32_28 = arith.constant 1 : i32
    %c0_i32_29 = arith.constant 0 : i32
    %c0_i32_30 = arith.constant 0 : i32
    %53 = tpu.memref_slice %arg6[%1, %c0_i32_29, %c0_i32_30] : memref<8x64x256xf32, #tpu.memory_space<any>> -> memref<4x64x256xf32, #tpu.memory_space<any>>
    %c0_i32_31 = arith.constant 0 : i32
    %c0_i32_32 = arith.constant 0 : i32
    %c0_i32_33 = arith.constant 0 : i32
    %54 = tpu.memref_slice %arg7[%c0_i32_31, %c1_i32_28, %c0_i32_32, %c0_i32_33] : memref<4x2x64x256xf32, #tpu.memory_space<vmem>> -> memref<4x1x64x256xf32, #tpu.memory_space<vmem>>
    %55 = tpu.memref_squeeze %54 : memref<4x1x64x256xf32, #tpu.memory_space<vmem>> -> memref<4x64x256xf32, #tpu.memory_space<vmem>>
    tpu.wait_dma2 semaphore(%arg8 : memref<!tpu.dma_semaphore, #tpu.memory_space<semaphore_mem>>) src(%53 : memref<4x64x256xf32, #tpu.memory_space<any>>) dst(%55 : memref<4x64x256xf32, #tpu.memory_space<vmem>>)
    return
  }
  func.func @transform_0(%arg0: i32) -> (i32, i32, i32) {
    %c0_i32 = arith.constant 0 : i32
    %c0_i32_0 = arith.constant 0 : i32
    %c0_i32_1 = arith.constant 0 : i32
    return %arg0, %c0_i32, %c0_i32_0 : i32, i32, i32
  }
  func.func @transform_1(%arg0: i32) -> (i32, i32) {
    %c0_i32 = arith.constant 0 : i32
    %c0_i32_0 = arith.constant 0 : i32
    %c0_i32_1 = arith.constant 0 : i32
    return %c0_i32, %c0_i32_0 : i32, i32
  }
  func.func @transform_2(%arg0: i32) -> (i32, i32) {
    %c0_i32 = arith.constant 0 : i32
    %c0_i32_0 = arith.constant 0 : i32
    %c0_i32_1 = arith.constant 0 : i32
    return %c0_i32, %c0_i32_0 : i32, i32
  }
  func.func @transform_3(%arg0: i32) -> (i32, i32) {
    %c0_i32 = arith.constant 0 : i32
    %c0_i32_0 = arith.constant 0 : i32
    %c0_i32_1 = arith.constant 0 : i32
    return %c0_i32, %c0_i32_0 : i32, i32
  }
  func.func @transform_4(%arg0: i32) -> (i32, i32) {
    %c0_i32 = arith.constant 0 : i32
    %c0_i32_0 = arith.constant 0 : i32
    %c0_i32_1 = arith.constant 0 : i32
    return %c0_i32, %c0_i32_0 : i32, i32
  }
  func.func @transform_6(%arg0: i32) -> (i32, i32, i32, i32) {
    %c0_i32 = arith.constant 0 : i32
    %c0_i32_0 = arith.constant 0 : i32
    %c0_i32_1 = arith.constant 0 : i32
    %c0_i32_2 = arith.constant 0 : i32
    return %arg0, %c0_i32, %c0_i32_0, %c0_i32_1 : i32, i32, i32, i32
  }
}

</mosaic_0001>

<bundles_post_ra>
// kernel: tpu_custom_call.1
= control target key start
LH: loop header
LB: loop body
LE: loop exit
PB: predicated region body
PF: predicated region fallthrough
CT: control target
= control target key end

     0   :  { %11 = vsyncpa [#allocation4], 0  ;;  %s4093_s0 = inlined_call_operand.hbm [shape: f32[8,64,256], index: 0, kind: input, shape index: {}]   ;;  %s4094_s1 = inlined_call_operand.vmem [shape: f32[256,16], index: 1, kind: input, shape index: {}]   ;;  %s4095_s2 = inlined_call_operand.vmem [shape: f32[16,256], index: 2, kind: input, shape index: {}]   ;;  %s4096_s3 = inlined_call_operand.vmem [shape: f32[1,256], index: 3, kind: input, shape index: {}]   ;;  %s4097_s4 = inlined_call_operand.vmem [shape: f32[1,256], index: 4, kind: input, shape index: {}]   ;;  %s4098_s5 = inlined_call_operand.hbm [shape: f32[8,64,256], index: 5, kind: input, shape index: {}]   ;;  %s4099_s6 = inlined_call_operand.hbm [shape: f32[8,2,64,256], index: 6, kind: output, shape index: {}]  }
   0x1   :  { %13 = vsyncpa [#allocation4 + $0x1], 0 }
   0x2   :  { %14 = vsyncpa [#allocation5], 0 }
   0x3   :  { %16 = vsyncpa [#allocation5 + $0x1], 0  ;;  %s2221_s21 = smov 0   ;;  %s2223_s22 = smov 0  }
   0x4   :  { %s2225_s23 = smov 0   ;;  %s2227_s24 = smov 0  }
   0x5 LB: > { %s2242_s25 = sadd.s32 4294967295, %s2175_s24   ;;  %s1892_s26 = sadd.s32 4294967294, %s2175_s24   ;;  %s2175_s24 = sphi %s2227_s24, %s4367_s24   ;;  %s2171_s23 = sphi %s2225_s23, %s4366_s23   ;;  %s2167_s22 = sphi %s2223_s22, %s4365_s22   ;;  %s2163_s21 = sphi %s2221_s21, %s4364_s21  }
   0x6   : > { %s2246_s27 = sadd.s32 1, %s2175_s24   ;;  %s29_s28 = sadd.s32 1, %s2171_s23 }
   0x7   : > { %s26_s29 = ssub.s32 %s2175_s24, %s2246_s27  ;;  %p36_p0 = scmp.ne.s32.totalorder %s2171_s23, %s2167_s22 }
   0x8   : > { %p27_p1 = scmp.eq.s32.totalorder %s26_s29, 0  ;;  %p37_p2 = scmp.eq.s32.totalorder %s2175_s24, 0 }
   0x9   : > { %p42_p3 = scmp.ne.s32.totalorder %s2167_s22, %s2163_s21  ;;  %p43_p4 = scmp.eq.s32.totalorder %s2242_s25, 0 }
   0xa   : > { %s2258_s30 = scalar_select %p27_p1, %s2171_s23, %s29_s28  }
   0xb   : > { %p2260_p5 = por %p37_p2, %p36_p0  ;;  %p2264_p6 = por %p43_p4, %p42_p3 }
   0xc   : > { %p150_p7 = scmp.eq.s32.totalorder %s2242_s25, 1  ;;  %p156_p8 = scmp.eq.s32.totalorder %s1892_s26, 1 }
   0xd   : > { %p1934_p10 = scmp.lt.s32.totalorder %s2175_s24, 2  ;;  %s188_s11 = sand.u32 1, %s2171_s23  }
   0xe   : > { %p2271_p11 = por %p150_p7, %p36_p0  ;;  %p2275_p12 = por %p156_p8, %p42_p3 }
   0xf   : > { %s1917_s12 = sshll.u32 %s2175_s24, 9  ;;  %s1895_s13 = sshll.u32 %s188_s11, 9 }
  0x10   : > { %s198_s16 = scalar_lea.hbm %s4093_s0, %s1917_s12  ;;  %s192_s18 = scalar_lea.vmem [#allocation3], %s1895_s13 }
  0x11   : > { %s199_s17 = sshll.u32 %s198_s16, 4  ;;  %s201_s19 = sshll.u32 %s192_s18, 4  ;;  %s200_s17 = int_to_ptr.hbm [resolvable:$true] %s199_s17  ;;  %s202_s19 = int_to_ptr.vmem [resolvable:$true] %s201_s19 }
  0x12   : > { %p2286_p13 = pnand %p1934_p10, %p2260_p5  ;;  %p1899_p0 = scmp.ge.s32.totalorder %s2175_s24, 1 }
  0x13   : > { %p209_p1 = scmp.lt.s32.totalorder %s2175_s24, 3  ;;  %s189_s26 = scalar_lea.sflag [#allocation4], %s188_s11 }
  0x14   : > { %s2053_s28 = sshra.s32 %s200_s17, 4  ;;  %p2057_p3 = pneg %p2286_p13  ;;  %s2054_s28 = int_to_ptr.hbm [resolvable:$true] %s2053_s28 }
  0x15   : > { %s2055_s29 = scalar_lea.hbm %s2054_s28, 512  ;;  %s2060_s7 = scalar_lea.hbm %s4093_s0, 1024 }
  0x16   : > { %p2056_p2 = scmp.ne.s32.totalorder %s2054_s28, %s2055_s29  ;;  %p2061_p5 = scmp.lt.s32.totalorder %s2054_s28, %s4093_s0 }
  0x17   : > { %p2062_p8 = scmp.lt.s32.totalorder %s2060_s7, %s2055_s29 }
  0x18   : > { %p2058_p4 = pnand %p2057_p3, %p2056_p2 }
  0x19   : > { %p2063_p10 = por %p2062_p8, %p2061_p5 }
  0x1a   : > { %p2059_p7 = pneg %p2058_p4 }
  0x1c   : > { %p2064_p9 = pnand %p2063_p10, %p2059_p7 }
  0x1e   : > { %2067 = shalt.err (!%p2064_p9)
}
  0x1f   : > { %s2177_s11 = smov 256   ;;  %s2178_s16 = smov 16  }
  0x20   : > { %1929 = dma.hbm_to_vmem [thread:$0]  (!%p2286_p13), %s200_s17, 8192, %s202_s19, %s189_s26, %s2177_s11, %s2177_s11, %s2178_s16  }
  0x21   : > { %p210_p2 = pnand %p1899_p0, %p209_p1 }
  0x23   : > { %213 = sbr.rel (%p210_p2) target bundleno = 825 (0x339), region = 40 }
  0x28   : > { %s2307_s18 = sand.u32 1, %s2167_s22  }
  0x29   : > { %s1900_s28 = sshll.u32 %s2307_s18, 9  ;;  %s216_s29 = scalar_lea.sflag [#allocation4], %s2307_s18 }
  0x2a   : > { %s2311_s12 = scalar_lea.vmem [#allocation3], %s1900_s28 }
  0x2b   : > { %2152 = dma.done.wait (%p2264_p6), %s216_s29, 8192  }
  0x2c   : > { %2154 = vsyncadd (%p2264_p6), %s216_s29, 4294959104  ;;  %v460_v0 = vld [vmem:[%s4094_s1 + $0x78] sm:$0xff]  ;;  %v459_v2 = vld [vmem:[%s4094_s1 + $0x70] sm:$0xff]  ;;  %v2179_v6 = vmov 64.0   ;;  %vm485_vm1 = vcmask 1041409   ;;  %vm487_vm2 = vcmask 1042434  }
  0x2d   : > { %v476_v1 = vld [vmem:[%s4094_s1 + $0xf8] sm:$0xff]  ;;  %496 = vmatpush.msra.mxu0 %v460_v0  ;;  %v475_v3 = vld [vmem:[%s4094_s1 + $0xf0] sm:$0xff]  ;;  %v458_v4 = vld [vmem:[%s4094_s1 + $0x68] sm:$0xff]  ;;  %1977 = vrcp.f32 %v2179_v6  ;;  %vm489_vm3 = vcmask 1043459   ;;  %vm541_vm4 = vcmask 130048   ;;  %vm626_vm12 = vcmask 1040384  }
  0x2e   : > { %516 = vmatpush.msra.mxu1 %v476_v1  ;;  %v474_v5 = vld [vmem:[%s4094_s1 + $0xe8] sm:$0xff]  ;;  %v457_v7 = vld [vmem:[%s4094_s1 + $0x60] sm:$0xff]  ;;  %v456_v9 = vld [vmem:[%s4094_s1 + $0x58] sm:$0xff]  ;;  %s1901_s14 = sshll.u32 %s2307_s18, 10  ;;  %s1919_s15 = sshll.u32 %s2242_s25, 9 }
  0x2f   : > { %497 = vmatpush.msra.mxu0 %v459_v2  ;;  %v473_v8 = vld [vmem:[%s4094_s1 + $0xe0] sm:$0xff]  ;;  %v472_v10 = vld [vmem:[%s4094_s1 + $0xd8] sm:$0xff]  ;;  %v455_v12 = vld [vmem:[%s4094_s1 + $0x50] sm:$0xff]  ;;  %s252_s16 = scalar_lea.hbm %s4098_s5, %s1919_s15  ;;  %s3303_s28 = scalar_lea.vmem [#allocation6], %s1901_s14 }
  0x30   : > { %517 = vmatpush.msra.mxu1 %v475_v3  ;;  %v471_v13 = vld [vmem:[%s4094_s1 + $0xd0] sm:$0xff]  ;;  %v454_v14 = vld [vmem:[%s4094_s1 + $0x48] sm:$0xff]  ;;  %v2362_v16 = vld [vmem:[%s2311_s12] sm:$0xff]  ;;  %s254_s29 = sshll.u32 %s252_s16, 4  ;;  %s2087_s7 = scalar_lea.hbm %s4098_s5, 1024  ;;  %s255_s29 = int_to_ptr.hbm [resolvable:$true] %s254_s29 }
  0x31   : > { %498 = vmatpush.msra.mxu0 %v458_v4  ;;  %v470_v15 = vld [vmem:[%s4094_s1 + $0xc8] sm:$0xff]  ;;  %v2365_v17 = vld [vmem:[%s2311_s12 + $0x10] sm:$0xff]  ;;  %v2368_v18 = vld [vmem:[%s2311_s12 + $0x20] sm:$0xff]  ;;  %s2083_s19 = sshra.s32 %s255_s29, 4  ;;  %s2084_s19 = int_to_ptr.hbm [resolvable:$true] %s2083_s19 }
  0x32   : > { %518 = vmatpush.msra.mxu1 %v474_v5  ;;  %v453_v20 = vld [vmem:[%s4094_s1 + $0x40] sm:$0xff]  ;;  %v452_v22 = vld [vmem:[%s4094_s1 + $0x38] sm:$0xff]  ;;  %v326_v23 = vadd.f32 %v2365_v17, %v2362_v16  ;;  %v2383_v24 = vld [vmem:[%s2311_s12 + $0x30] sm:$0xff]  ;;  %s2085_s20 = scalar_lea.hbm %s2084_s19, 512  ;;  %p2088_p9 = scmp.lt.s32.totalorder %s2084_s19, %s4098_s5 }
  0x33   : > { %499 = vmatpush.msra.mxu0 %v457_v7  ;;  %v2347_v11 = vpop.eup %1977  ;;  %v469_v21 = vld [vmem:[%s4094_s1 + $0xc0] sm:$0xff]  ;;  %v2389_v26 = vld [vmem:[%s2311_s12 + $0x90] sm:$0xff]  ;;  %v468_v27 = vld [vmem:[%s4094_s1 + $0xb8] sm:$0xff]  ;;  %p2086_p6 = scmp.ne.s32.totalorder %s2084_s19, %s2085_s20  ;;  %p2089_p13 = scmp.lt.s32.totalorder %s2087_s7, %s2085_s20 }
  0x34   : > { %519 = vmatpush.msra.mxu1 %v473_v8  ;;  %v431_v19 = vmul.f32 64.0, %v2347_v11  ;;  %v2386_v25 = vld [vmem:[%s2311_s12 + $0x80] sm:$0xff]  ;;  %v451_v28 = vld [vmem:[%s4094_s1 + $0x30] sm:$0xff]  ;;  %v327_v30 = vadd.f32 %v326_v23, %v2368_v18  ;;  %v450_v36 = vld [vmem:[%s4094_s1 + $0x28] sm:$0xff]  ;;  %vm435_vm0 = vweird.f32 %v2347_v11 }
  0x35   : > { %500 = vmatpush.msra.mxu0 %v456_v9  ;;  %v2398_v29 = vld [vmem:[%s2311_s12 + $0xa0] sm:$0xff]  ;;  %v352_v31 = vadd.f32 %v2389_v26, %v2386_v25  ;;  %v467_v32 = vld [vmem:[%s4094_s1 + $0xb0] sm:$0xff]  ;;  %v466_v42 = vld [vmem:[%s4094_s1 + $0xa8] sm:$0xff]  ;;  %p2090_p0 = por %p2089_p13, %p2088_p9 }
  0x36   : > { %520 = vmatpush.msra.mxu1 %v472_v10  ;;  %v2407_v33 = vld [vmem:[%s2311_s12 + $0x40] sm:$0xff]  ;;  %v2410_v34 = vld [vmem:[%s2311_s12 + $0xb0] sm:$0xff]  ;;  %v432_v35 = vsub.f32 1.0, %v431_v19  ;;  %v328_v40 = vadd.f32 %v327_v30, %v2383_v24  ;;  %v448_v58 = vld [vmem:[%s4094_s1 + $0x18] sm:$0xff] }
  0x37   : > { %501 = vmatpush.msra.mxu0 %v455_v12  ;;  %v2416_v37 = vld [vmem:[%s2311_s12 + $0x100] sm:$0xff]  ;;  %v2419_v38 = vld [vmem:[%s2311_s12 + $0x110] sm:$0xff]  ;;  %v353_v41 = vadd.f32 %v352_v31, %v2398_v29  ;;  %v464_v59 = vld [vmem:[%s4094_s1 + $0x98] sm:$0xff]  ;;  %p2091_p1 = pnand %p2090_p0, %p2086_p6 }
  0x38   : > { %521 = vmatpush.msra.mxu1 %v471_v13  ;;  %v2422_v39 = vld [vmem:[%s2311_s12 + $0x120] sm:$0xff]  ;;  %v2430_v43 = vld [vmem:[%s2311_s12 + $0x50] sm:$0xff]  ;;  %v378_v45 = vadd.f32 %v2419_v38, %v2416_v37  ;;  %v329_v51 = vadd.f32 %v328_v40, %v2407_v33  ;;  %v433_v57 = vmul.f32 %v2347_v11, %v432_v35  ;;  %v2489_v4 = vld [vmem:[%s2311_s12 + $0x8] sm:$0xff] }
  0x39   : > { %502 = vmatpush.msra.mxu0 %v454_v14  ;;  %4209 = vst [vmem:[#allocation11_spill] sm:$0xff] %v2422_v39  ;;  %v2433_v44 = vld [vmem:[%s2311_s12 + $0xc0] sm:$0xff]  ;;  %v2447_v49 = vld [vmem:[%s2311_s12 + $0x130] sm:$0xff]  ;;  %v354_v52 = vadd.f32 %v353_v41, %v2410_v34  ;;  %v2492_v5 = vld [vmem:[%s2311_s12 + $0x18] sm:$0xff] }
  0x3a   : > { %522 = vmatpush.msra.mxu1 %v470_v15  ;;  %v449_v46 = vld [vmem:[%s4094_s1 + $0x20] sm:$0xff]  ;;  %4210 = vst [vmem:[#allocation12_spill] sm:$0xff] %v2447_v49  ;;  %v2455_v53 = vld [vmem:[%s2311_s12 + $0xd0] sm:$0xff]  ;;  %v379_v56 = vadd.f32 %v378_v45, %v2422_v39  ;;  %v330_v63 = vadd.f32 %v329_v51, %v2430_v43  ;;  %v2510_v14 = vld [vmem:[%s2311_s12 + $0x28] sm:$0xff]  ;;  %v339_v15 = vadd.f32 %v2492_v5, %v2489_v4 }
  0x3b   : > { %503 = vmatpush.msra.mxu0 %v453_v20  ;;  %v465_v47 = vld [vmem:[%s4094_s1 + $0xa0] sm:$0xff]  ;;  %v2458_v54 = vld [vmem:[%s2311_s12 + $0x190] sm:$0xff]  ;;  %v355_v0 = vadd.f32 %v354_v52, %v2433_v44  ;;  %v2524_v23 = vld [vmem:[%s2311_s12 + $0x38] sm:$0xff] }
  0x3c   : > { %523 = vmatpush.msra.mxu1 %v469_v21  ;;  %v2444_v48 = vld [vmem:[%s2311_s12 + $0x60] sm:$0xff]  ;;  %4212 = vst [vmem:[#allocation14_spill] sm:$0xff] %v2458_v54  ;;  %v2472_v60 = vld [vmem:[%s2311_s12 + $0x70] sm:$0xff]  ;;  %v380_v3 = vadd.f32 %v379_v56, %v2447_v49  ;;  %v2536_v35 = vld [vmem:[%s2311_s12 + $0x98] sm:$0xff]  ;;  %v340_v40 = vadd.f32 %v339_v15, %v2510_v14 }
  0x3d   : > { %504 = vmatpush.msra.mxu0 %v452_v22  ;;  %v2450_v50 = vld [vmem:[%s2311_s12 + $0x180] sm:$0xff]  ;;  %v2485_v2 = vld [vmem:[%s2311_s12 + $0x1b0] sm:$0xff]  ;;  %v331_v10 = vadd.f32 %v330_v63, %v2444_v48  ;;  %v356_v12 = vadd.f32 %v355_v0, %v2455_v53  ;;  %v434_v22 = vadd.f32 %v2347_v11, %v433_v57  ;;  %v462_v41 = vld [vmem:[%s4094_s1 + $0x88] sm:$0xff] }
  0x3e   : > { %524 = vmatpush.msra.mxu1 %v468_v27  ;;  %4211 = vst [vmem:[#allocation13_spill] sm:$0xff] %v2450_v50  ;;  %v2461_v55 = vld [vmem:[%s2311_s12 + $0x1a0] sm:$0xff]  ;;  %v404_v1 = vadd.f32 %v2458_v54, %v2450_v50  ;;  %v447_v6 = vld [vmem:[%s4094_s1 + $0x10] sm:$0xff]  ;;  %v446_v27 = vld [vmem:[%s4094_s1 + $0x8] sm:$0xff] }
  0x3f   : > { %505 = vmatpush.msra.mxu0 %v451_v28  ;;  %4213 = vst [vmem:[#allocation15_spill] sm:$0xff] %v2461_v55  ;;  %v2475_v61 = vld [vmem:[%s2311_s12 + $0xe0] sm:$0xff]  ;;  %v463_v7 = vld [vmem:[%s4094_s1 + $0x90] sm:$0xff]  ;;  %v332_v28 = vadd.f32 %v331_v10, %v2472_v60  ;;  %v2566_v63 = vld [vmem:[%s2311_s12 + $0xb8] sm:$0xff] }
  0x40   : > { %525 = vmatpush.msra.mxu1 %v467_v32  ;;  %v2478_v62 = vld [vmem:[%s2311_s12 + $0x140] sm:$0xff]  ;;  %4215 = vst [vmem:[#allocation17_spill] sm:$0xff] %v2485_v2  ;;  %v2501_v8 = vld [vmem:[%s2311_s12 + $0xf0] sm:$0xff]  ;;  %v405_v13 = vadd.f32 %v404_v1, %v2461_v55  ;;  %v357_v30 = vadd.f32 %v356_v12, %v2475_v61  ;;  %v2533_v32 = vld [vmem:[%s2311_s12 + $0x88] sm:$0xff]  ;;  %v341_v1 = vadd.f32 %v340_v40, %v2524_v23 }
  0x41   : > { %4214 = vst [vmem:[#allocation16_spill] sm:$0xff] %v2478_v62  ;;  %506 = vmatpush.msra.mxu0 %v450_v36  ;;  %v2504_v9 = vld [vmem:[%s2311_s12 + $0x150] sm:$0xff]  ;;  %v2515_v19 = vld [vmem:[%s2311_s12 + $0x160] sm:$0xff]  ;;  %v381_v21 = vadd.f32 %v380_v3, %v2478_v62  ;;  %v2539_v36 = vld [vmem:[%s2311_s12 + $0xa8] sm:$0xff]  ;;  %v333_v57 = vrot.slane %v332_v28, 4  ;;  %v2579_v12 = vsel %vm435_vm0, %v2347_v11, %v434_v22 }
  0x42   : > { %526 = vmatpush.msra.mxu1 %v466_v42  ;;  %4216 = vst [vmem:[#allocation18_spill] sm:$0xff] %v2504_v9  ;;  %v2518_v20 = vld [vmem:[%s2311_s12 + $0x1c0] sm:$0xff]  ;;  %v406_v31 = vadd.f32 %v405_v13, %v2485_v2  ;;  %v2546_v42 = vld [vmem:[%s2311_s12 + $0x1d0] sm:$0xff]  ;;  %v2569_v0 = vld [vmem:[%s2311_s12 + $0x108] sm:$0xff] }
  0x43   : > { %507 = vmatpush.msra.mxu0 %v449_v46  ;;  %4217 = vst [vmem:[#allocation19_spill] sm:$0xff] %v2515_v19  ;;  %v382_v45 = vadd.f32 %v381_v21, %v2504_v9  ;;  %v2550_v46 = vld [vmem:[%s2311_s12 + $0x48] sm:$0xff]  ;;  %v445_v51 = vld [vmem:[%s4094_s1] sm:$0xff]  ;;  %v2561_v56 = vld [vmem:[%s2311_s12 + $0x170] sm:$0xff] }
  0x44   : > { %527 = vmatpush.msra.mxu1 %v465_v47  ;;  %4218 = vst [vmem:[#allocation20_spill] sm:$0xff] %v2518_v20  ;;  %v365_v47 = vadd.f32 %v2536_v35, %v2533_v32  ;;  %v461_v52 = vld [vmem:[%s4094_s1 + $0x80] sm:$0xff]  ;;  %v2582_v13 = vld [vmem:[%s2311_s12 + $0x58] sm:$0xff]  ;;  %v2593_v40 = vld [vmem:[%s2311_s12 + $0xc8] sm:$0xff]  ;;  %v342_v22 = vadd.f32 %v341_v1, %v2550_v46 }
  0x45   : > { %508 = vmatpush.msra.mxu0 %v448_v58  ;;  %4219 = vst [vmem:[#allocation21_spill] sm:$0xff] %v2546_v42  ;;  %v358_v58 = vadd.f32 %v357_v30, %v2501_v8  ;;  %v2573_v3 = vld [vmem:[%s2311_s12 + $0x1e0] sm:$0xff]  ;;  %v383_v10 = vadd.f32 %v382_v45, %v2515_v19  ;;  %v2585_v15 = vld [vmem:[%s2311_s12 + $0x118] sm:$0xff]  ;;  %v2596_v11 = vld [vmem:[%s2311_s12 + $0x128] sm:$0xff] }
  0x46   : > { %528 = vmatpush.msra.mxu1 %v464_v59  ;;  %4220 = vst [vmem:[#allocation22_spill] sm:$0xff] %v2561_v56  ;;  %v407_v59 = vadd.f32 %v406_v31, %v2518_v20  ;;  %v366_v21 = vadd.f32 %v365_v47, %v2539_v36  ;;  %v2601_v47 = vld [vmem:[%s2311_s12 + $0x68] sm:$0xff]  ;;  %v391_v2 = vadd.f32 %v2585_v15, %v2569_v0  ;;  %v2624_v54 = vld [vmem:[%s2311_s12 + $0x78] sm:$0xff] }
  0x47   : > { %509 = vmatpush.msra.mxu0 %v447_v6  ;;  %4221 = vst [vmem:[#allocation23_spill] sm:$0xff] %v2573_v3  ;;  %v2589_v6 = vld [vmem:[%s2311_s12 + $0x1f0] sm:$0xff]  ;;  %v359_v30 = vrot.slane %v358_v58, 4  ;;  %v384_v45 = vadd.f32 %v383_v10, %v2561_v56  ;;  %v2620_v10 = vld [vmem:[%s2311_s12 + $0x1a8] sm:$0xff]  ;;  %v343_v50 = vadd.f32 %v342_v22, %v2582_v13  ;;  %v2638_v9 = vld [vmem:[%s2311_s12 + $0x1b8] sm:$0xff] }
  0x48   : > { %529 = vmatpush.msra.mxu1 %v463_v7  ;;  %4222 = vst [vmem:[#allocation24_spill] sm:$0xff] %v2589_v6  ;;  %v334_v7 = vadd.f32 %v333_v57, %v332_v28  ;;  %v408_v31 = vadd.f32 %v407_v59, %v2546_v42  ;;  %v2604_v28 = vld [vmem:[%s2311_s12 + $0x188] sm:$0xff]  ;;  %v2607_v57 = vld [vmem:[%s2311_s12 + $0x198] sm:$0xff]  ;;  %v367_v59 = vadd.f32 %v366_v21, %v2566_v63 }
  0x49   : > { %4223 = vst [vmem:[#allocation25_spill] sm:$0xff] %v2596_v11  ;;  %510 = vmatpush.msra.mxu0 %v446_v27  ;;  %v360_v42 = vadd.f32 %v359_v30, %v358_v58  ;;  %v2614_v27 = vld [vmem:[%s2311_s12 + $0xd8] sm:$0xff]  ;;  %v385_v21 = vrot.slane %v384_v45, 4  ;;  %v392_v30 = vadd.f32 %v391_v2, %v2596_v11  ;;  %v2651_v11 = vld [vmem:[%s2311_s12 + $0x1c8] sm:$0xff] }
  0x4a   : > { %530 = vmatpush.msra.mxu1 %v462_v41  ;;  %4224 = vst [vmem:[#allocation26_spill] sm:$0xff] %v2604_v28  ;;  %v335_v20 = vrot.slane %v334_v7, 2  ;;  %v409_v1 = vadd.f32 %v408_v31, %v2573_v3  ;;  %v2617_v41 = vld [vmem:[%s2311_s12 + $0x138] sm:$0xff]  ;;  %v368_v58 = vadd.f32 %v367_v59, %v2593_v40  ;;  %v417_v31 = vadd.f32 %v2607_v57, %v2604_v28 }
  0x4b   : > { %4225 = vst [vmem:[#allocation27_spill] sm:$0xff] %v2607_v57  ;;  %511 = vmatpush.msra.mxu0 %v445_v51  ;;  %v361_v55 = vrot.slane %v360_v42, 2  ;;  %v2632_v51 = vld [vmem:[%s2311_s12 + $0xe8] sm:$0xff]  ;;  %v344_v59 = vadd.f32 %v343_v50, %v2601_v47  ;;  %v386_v19 = vadd.f32 %v385_v21, %v384_v45  ;;  %v393_v56 = vadd.f32 %v392_v30, %v2617_v41  ;;  %v2648_v57 = vld [vmem:[%s2311_s12 + $0x158] sm:$0xff] }
  0x4c   : > { %4226 = vst [vmem:[#allocation28_spill] sm:$0xff] %v2617_v41  ;;  %531 = vmatpush.msra.mxu1 %v461_v52  ;;  %v336_v3 = vadd.f32 %v335_v20, %v334_v7  ;;  %v410_v22 = vadd.f32 %v409_v1, %v2589_v6  ;;  %v2635_v52 = vld [vmem:[%s2311_s12 + $0x148] sm:$0xff]  ;;  %v369_v2 = vadd.f32 %v368_v58, %v2614_v27  ;;  %v2645_v6 = vld [vmem:[%s2311_s12 + $0xf8] sm:$0xff] }
  0x4d   : > { %4227 = vst [vmem:[#allocation29_spill] sm:$0xff] %v2620_v10  ;;  %v418_v20 = vadd.f32 %v417_v31, %v2620_v10  ;;  %v362_v28 = vadd.f32 %v361_v55, %v360_v42  ;;  %v345_v50 = vadd.f32 %v344_v59, %v2624_v54  ;;  %v387_v45 = vrot.slane %v386_v19, 2  ;;  %v2658_v10 = vld [vmem:[%s2311_s12 + $0x168] sm:$0xff]  ;;  %v2661_v39 = vld [vmem:[%s2311_s12 + $0x1d8] sm:$0xff] }
  0x4e   : > { %4228 = vst [vmem:[#allocation30_spill] sm:$0xff] %v2635_v52  ;;  %v337_v7 = vrot.slane %v336_v3, 1  ;;  %v411_v1 = vrot.slane %v410_v22, 4  ;;  %v370_v21 = vadd.f32 %v369_v2, %v2632_v51  ;;  %v394_v58 = vadd.f32 %v393_v56, %v2635_v52 }
  0x4f   : > { %4229 = vst [vmem:[#allocation31_spill] sm:$0xff] %v2638_v9  ;;  %v419_v30 = vadd.f32 %v418_v20, %v2638_v9  ;;  %v363_v55 = vrot.slane %v362_v28, 1  ;;  %v346_v41 = vrot.slane %v345_v50, 4  ;;  %v388_v49 = vadd.f32 %v387_v45, %v386_v19 }
  0x50   : > { %4230 = vst [vmem:[#allocation32_spill] sm:$0xff] %v2645_v6  ;;  %v338_v31 = vadd.f32 %v337_v7, %v336_v3  ;;  %v412_v42 = vadd.f32 %v411_v1, %v410_v22  ;;  %v371_v59 = vadd.f32 %v370_v21, %v2645_v6  ;;  %v395_v2 = vadd.f32 %v394_v58, %v2648_v57  ;;  %v2668_v3 = vld [vmem:[%s2311_s12 + $0x178] sm:$0xff]  ;;  %v2671_v22 = vld [vmem:[%s2311_s12 + $0x1e8] sm:$0xff] }
  0x51   : > { %4231 = vst [vmem:[#allocation33_spill] sm:$0xff] %v2648_v57  ;;  %v420_v62 = vadd.f32 %v419_v30, %v2651_v11  ;;  %v364_v56 = vadd.f32 %v363_v55, %v362_v28  ;;  %v347_v7 = vadd.f32 %v346_v41, %v345_v50  ;;  %v389_v1 = vrot.slane %v388_v49, 1  ;;  %v2677_v57 = vld [vmem:[%s2311_s12 + $0x1f8] sm:$0xff]  ;;  %s253_s12 = scalar_lea.vmem %s3303_s28, 128 [#allocation6] }
  0x52   : > { %4232 = vst [vmem:[#allocation34_spill] sm:$0xff] %v2651_v11  ;;  %v413_v52 = vrot.slane %v412_v42, 2  ;;  %v437_v20 = vmul.f32 %v2579_v12, %v338_v31  ;;  %v372_v9 = vrot.slane %v371_v59, 4  ;;  %v396_v19 = vadd.f32 %v395_v2, %v2658_v10  ;;  %s3314_s17 = sshll.u32 %s253_s12, 4  ;;  %s257_s17 = int_to_ptr.vmem [resolvable:$true] %s3314_s17 }
  0x53   : > { %4233 = vst [vmem:[#allocation35_spill] sm:$0xff] %v2661_v39  ;;  %v421_v45 = vadd.f32 %v420_v62, %v2661_v39  ;;  %v439_v58 = vmul.f32 %v2579_v12, %v364_v56  ;;  %v348_v28 = vrot.slane %v347_v7, 2  ;;  %v390_v30 = vadd.f32 %v389_v1, %v388_v49 }
  0x54   : > { %4234 = vst [vmem:[#allocation36_spill] sm:$0xff] %v2671_v22  ;;  %v414_v21 = vadd.f32 %v413_v52, %v412_v42  ;;  %v373_v55 = vadd.f32 %v372_v9, %v371_v59  ;;  %v397_v31 = vadd.f32 %v396_v19, %v2668_v3 }
  0x55   : > { %4235 = vst [vmem:[#allocation37_spill] sm:$0xff] %v2677_v57  ;;  %v422_v11 = vadd.f32 %v421_v45, %v2671_v22  ;;  %v486_v41 = vsel %vm485_vm1, %v439_v58, %v437_v20  ;;  %v349_v50 = vadd.f32 %v348_v28, %v347_v7  ;;  %v441_v2 = vmul.f32 %v2579_v12, %v390_v30 }
  0x56   : > { %v415_v6 = vrot.slane %v414_v21, 1  ;;  %v374_v62 = vrot.slane %v373_v55, 2  ;;  %v398_v52 = vrot.slane %v397_v31, 4 }
  0x57   : > { %v423_v42 = vadd.f32 %v422_v11, %v2677_v57  ;;  %v350_v39 = vrot.slane %v349_v50, 1  ;;  %v488_v49 = vsel %vm487_vm2, %v441_v2, %v486_v41 }
  0x58   : > { %v416_v56 = vadd.f32 %v415_v6, %v414_v21  ;;  %v375_v9 = vadd.f32 %v374_v62, %v373_v55  ;;  %v399_v59 = vadd.f32 %v398_v52, %v397_v31 }
  0x59   : > { %v424_v1 = vrot.slane %v423_v42, 4  ;;  %v351_v45 = vadd.f32 %v350_v39, %v349_v50 }
  0x5a   : > { %v443_v19 = vmul.f32 %v2579_v12, %v416_v56  ;;  %v376_v20 = vrot.slane %v375_v9, 1  ;;  %v400_v58 = vrot.slane %v399_v59, 2  ;;  %v539_v56 = vld [vmem:[%s4095_s2 + $0x10] sm:$0xff] }
  0x5b   : > { %v425_v7 = vadd.f32 %v424_v1, %v423_v42  ;;  %v438_v6 = vmul.f32 %v2579_v12, %v351_v45  ;;  %559 = vmatpush.msra.mxu2 %v539_v56 }
  0x5c   : > { %v490_v28 = vsel %vm489_vm3, %v443_v19, %v488_v49  ;;  %v377_v30 = vadd.f32 %v376_v20, %v375_v9  ;;  %v401_v22 = vadd.f32 %v400_v58, %v399_v59 }
  0x5d   : > { %512 = vmatmul.f32.vlgmr.msra.gmra.mxu0 %v490_v28  ;;  %v426_v11 = vrot.slane %v425_v7, 2 }
  0x5e   : > { %v402_v21 = vrot.slane %v401_v22, 1  ;;  %v440_v55 = vmul.f32 %v2579_v12, %v377_v30 }
  0x5f   : > { %v427_v57 = vadd.f32 %v426_v11, %v425_v7 }
  0x60   : > { %v403_v31 = vadd.f32 %v402_v21, %v401_v22  ;;  %v491_v2 = vsel %vm485_vm1, %v440_v55, %v438_v6  ;;  %v540_v22 = vld [vmem:[%s4095_s2 + $0x18] sm:$0xff] }
  0x61   : > { %v428_v41 = vrot.slane %v427_v57, 1  ;;  %579 = vmatpush.msra.mxu3 %v540_v22 }
  0x62   : > { %v442_v50 = vmul.f32 %v2579_v12, %v403_v31 }
  0x63   : > { %v429_v39 = vadd.f32 %v428_v41, %v427_v57  ;;  %v537_v57 = vld [vmem:[%s4095_s2] sm:$0xff] }
  0x64   : > { %v492_v52 = vsel %vm487_vm2, %v442_v50, %v491_v2  ;;  %560 = vmatpush.msra.mxu2 %v537_v57 }
  0x65   : > { %v444_v62 = vmul.f32 %v2579_v12, %v429_v39  ;;  %v538_v12 = vld [vmem:[%s4095_s2 + $0x8] sm:$0xff] }
  0x66   : > { %580 = vmatpush.msra.mxu3 %v538_v12 }
  0x67   : > { %v493_v42 = vsel %vm489_vm3, %v444_v62, %v492_v52 }
  0x68   : > { %532 = vmatmul.f32.vlgmr.msra.gmra.mxu1 %v493_v42 }
  0xda   : > { %v513_v49 = vpop.f32.mrf.mxu0 }
  0xe5   : > { %v533_v9 = vpop.f32.mrf.mxu1 }
  0xe6   : > { %v534_v59 = vadd.f32 %v533_v9, %v513_v49 }
  0xe8   : > { %v536_v1 = vmax.f32 %v534_v59, 0.0 }
  0xea   : > { %1905 = vmatmul.msk.f32.vlgmr.msra.gmra.mxu2 %vm541_vm4, %v536_v1  ;;  %1906 = vmatmul.msk.f32.vlgmr.msra.gmra.mxu3 %vm541_vm4, %v536_v1 }
 0x16d   : > { %v562_v19 = vpop.f32.mrf.mxu2  ;;  %v582_v45 = vpop.f32.mrf.mxu3 }
 0x16e   : > { %v1907_v20 = vmul.f32 -1.442695, %v562_v19  ;;  %v1908_v58 = vmul.f32 -1.442695, %v582_v45 }
 0x170   : > { %1979 = vpow2.f32 %v1907_v20 }
 0x171   : > { %1981 = vpow2.f32 %v1908_v58 }
 0x176   : > { %v1980_v7 = vpop.eup %1979 }
 0x177   : > { %v1982_v28 = vpop.eup %1981  ;;  %v591_v30 = vadd.f32 1.0, %v1980_v7 }
 0x178   : > { %v592_v11 = vadd.f32 1.0, %v1982_v28 }
 0x179   : > { %1983 = vrcp.f32 %v591_v30  ;;  %vm598_vm7 = vweird.f32 %v591_v30  ;;  %v604_v56 = vand.u32 2147483648, %v591_v30  ;;  %v602_v22 = vand.u32 2147483647, %v591_v30 }
 0x17a   : > { %1985 = vrcp.f32 %v592_v11  ;;  %v619_v50 = vand.u32 2147483648, %v592_v11  ;;  %v617_v52 = vand.u32 2147483647, %v592_v11  ;;  %vm613_vm9 = vweird.f32 %v592_v11 }
 0x17b   : > { %v605_v59 = vor.u32 1.1754944e-38, %v604_v56  ;;  %vm603_vm13 = vcmp.eq.f32.partialorder %v602_v22, 8.507059e+37 }
 0x17c   : > { %v620_v12 = vor.u32 1.1754944e-38, %v619_v50  ;;  %vm618_vm11 = vcmp.eq.f32.partialorder %v617_v52, 8.507059e+37 }
 0x17f   : > { %v1984_v6 = vpop.eup %1983 }
 0x180   : > { %v1986_v21 = vpop.eup %1985  ;;  %v594_v55 = vmul.f32 %v1984_v6, %v591_v30  ;;  %vm599_vm5 = vweird.f32 %v1984_v6 }
 0x181   : > { %v609_v31 = vmul.f32 %v1986_v21, %v592_v11  ;;  %vm614_vm6 = vweird.f32 %v1986_v21  ;;  %vm600_vm8 = vmor %vm598_vm7, %vm599_vm5 }
 0x182   : > { %v595_v41 = vsub.f32 1.0, %v594_v55  ;;  %vm615_vm10 = vmor %vm613_vm9, %vm614_vm6 }
 0x183   : > { %v610_v2 = vsub.f32 1.0, %v609_v31 }
 0x184   : > { %v596_v39 = vmul.f32 %v1984_v6, %v595_v41 }
 0x185   : > { %v611_v62 = vmul.f32 %v1986_v21, %v610_v2 }
 0x186   : > { %v597_v42 = vadd.f32 %v1984_v6, %v596_v39 }
 0x187   : > { %v612_v57 = vadd.f32 %v1986_v21, %v611_v62 }
 0x188   : > { %v601_v49 = vsel %vm600_vm8, %v1984_v6, %v597_v42 }
 0x189   : > { %v616_v9 = vsel %vm615_vm10, %v1986_v21, %v612_v57  ;;  %v2708_v45 = vsel %vm603_vm13, %v605_v59, %v601_v49 }
 0x18a   : > { %v621_v1 = vsel %vm618_vm11, %v620_v12, %v616_v9 }
 0x18b   : > { %v2706_v19 = vrot.slane %v621_v1, 7 }
 0x18d   : > { %v627_v20 = vsel %vm626_vm12, %v2708_v45, %v2706_v19  ;;  %v628_v28 = vsel %vm485_vm1, %v2708_v45, %v2706_v19 }
 0x18e   : > { %v634_v58 = vperm.slane %v627_v20, 0  ;;  %v635_v7 = vperm.slane %v627_v20, 1 }
 0x190   : > { %v658_v30 = vmul.f32 %v634_v58, %v2407_v33  ;;  %v659_v11 = vmul.f32 %v635_v7, %v2550_v46  ;;  %v654_v6 = vmul.f32 %v634_v58, %v2368_v18  ;;  %v655_v21 = vmul.f32 %v635_v7, %v2510_v14 }
 0x191   : > { %v650_v55 = vmul.f32 %v634_v58, %v2362_v16  ;;  %v651_v31 = vmul.f32 %v635_v7, %v2489_v4  ;;  %v660_v39 = vmul.f32 %v634_v58, %v2430_v43  ;;  %v661_v50 = vmul.f32 %v635_v7, %v2582_v13 }
 0x192   : > { %v2722_v41 = vadd.f32 %v658_v30, %v2407_v33  ;;  %v2725_v2 = vadd.f32 %v659_v11, %v2550_v46  ;;  %v2730_v62 = vadd.f32 %v654_v6, %v2368_v18  ;;  %v2733_v52 = vadd.f32 %v655_v21, %v2510_v14 }
 0x193   : > { %v2736_v42 = vadd.f32 %v650_v55, %v2362_v16  ;;  %v2739_v56 = vadd.f32 %v651_v31, %v2489_v4  ;;  %v629_v33 = vrot.slane %v628_v28, 1  ;;  %v656_v22 = vmul.f32 %v634_v58, %v2383_v24 }
 0x194   : > { %v790_v46 = vadd.f32 %v2725_v2, %v2722_v41  ;;  %v784_v57 = vadd.f32 %v2733_v52, %v2730_v62  ;;  %v657_v14 = vmul.f32 %v635_v7, %v2524_v23  ;;  %v652_v16 = vmul.f32 %v634_v58, %v2365_v17 }
 0x195   : > { %v778_v18 = vadd.f32 %v2739_v56, %v2736_v42  ;;  %v653_v4 = vmul.f32 %v635_v7, %v2492_v5  ;;  %v2752_v12 = vadd.f32 %v660_v39, %v2430_v43  ;;  %v2755_v49 = vadd.f32 %v661_v50, %v2582_v13 }
 0x196   : > { %791 = vadd.xlane.f32.xlu2 %v790_v46  ;;  %785 = vadd.xlane.f32.xlu1 %v784_v57  ;;  %v2757_v9 = vperm.slane %v629_v33, 0  ;;  %v2759_v59 = vperm.slane %v629_v33, 1  ;;  %v2762_v1 = vadd.f32 %v656_v22, %v2383_v24  ;;  %v2765_v20 = vadd.f32 %v657_v14, %v2524_v23 }
 0x197   : > { %779 = vadd.xlane.f32.xlu0 %v778_v18  ;;  %v2768_v28 = vadd.f32 %v652_v16, %v2365_v17  ;;  %v2771_v30 = vadd.f32 %v653_v4, %v2492_v5  ;;  %v793_v43 = vadd.f32 %v2755_v49, %v2752_v12  ;;  %v664_v24 = vmul.f32 %v634_v58, %v2472_v60 }
 0x198   : > { %v666_v13 = vmul.f32 %v2757_v9, %v2386_v25  ;;  %v667_v11 = vmul.f32 %v2759_v59, %v2533_v32  ;;  %v665_v23 = vmul.f32 %v635_v7, %v2624_v54  ;;  %v787_v17 = vadd.f32 %v2765_v20, %v2762_v1 }
 0x199   : > { %v781_v5 = vadd.f32 %v2771_v30, %v2768_v28  ;;  %v662_v6 = vmul.f32 %v634_v58, %v2444_v48  ;;  %v663_v21 = vmul.f32 %v635_v7, %v2601_v47  ;;  %v2794_v39 = vadd.f32 %v664_v24, %v2472_v60 }
 0x19a   : > { %v2788_v55 = vadd.f32 %v666_v13, %v2386_v25  ;;  %v2791_v31 = vadd.f32 %v667_v11, %v2533_v32  ;;  %v2797_v50 = vadd.f32 %v665_v23, %v2624_v54  ;;  %v672_v7 = vmul.f32 %v2757_v9, %v2410_v34 }
 0x19b   : > { %v2800_v33 = vadd.f32 %v662_v6, %v2444_v48  ;;  %v2803_v58 = vadd.f32 %v663_v21, %v2601_v47  ;;  %v673_v32 = vmul.f32 %v2759_v59, %v2566_v63  ;;  %v670_v60 = vmul.f32 %v2757_v9, %v2398_v29 }
 0x19c   : > { %v802_v25 = vadd.f32 %v2791_v31, %v2788_v55  ;;  %v671_v54 = vmul.f32 %v2759_v59, %v2539_v36  ;;  %v799_v48 = vadd.f32 %v2797_v50, %v2794_v39  ;;  %v668_v46 = vmul.f32 %v2757_v9, %v2389_v26 }
 0x19d   : > { %v796_v47 = vadd.f32 %v2803_v58, %v2800_v33  ;;  %v669_v22 = vmul.f32 %v2759_v59, %v2536_v35  ;;  %v630_v57 = vsel %vm487_vm2, %v2708_v45, %v2706_v19  ;;  %v2827_v18 = vadd.f32 %v672_v7, %v2410_v34 }
 0x19e   : > { %794 = vadd.xlane.f32.xlu2 %v793_v43  ;;  %788 = vadd.xlane.f32.xlu1 %v787_v17  ;;  %v2830_v14 = vadd.f32 %v673_v32, %v2566_v63  ;;  %v2833_v16 = vadd.f32 %v670_v60, %v2398_v29  ;;  %v2836_v4 = vadd.f32 %v671_v54, %v2539_v36  ;;  %v631_v11 = vrot.slane %v630_v57, 2 }
 0x19f   : > { %782 = vadd.xlane.f32.xlu0 %v781_v5  ;;  %v2839_v43 = vadd.f32 %v668_v46, %v2389_v26  ;;  %v2842_v13 = vadd.f32 %v669_v22, %v2536_v35  ;;  %v678_v34 = vmul.f32 %v2757_v9, %v2475_v61  ;;  %v679_v36 = vmul.f32 %v2759_v59, %v2632_v51  ;;  %v4236_v46 = vld [vmem:[#allocation32_spill] sm:$0xff] }
 0x1a0   : > { %v811_v63 = vadd.f32 %v2830_v14, %v2827_v18  ;;  %v808_v29 = vadd.f32 %v2836_v4, %v2833_v16  ;;  %v676_v26 = vmul.f32 %v2757_v9, %v2455_v53  ;;  %v677_v24 = vmul.f32 %v2759_v59, %v2614_v27 }
 0x1a1   : > { %v805_v35 = vadd.f32 %v2842_v13, %v2839_v43  ;;  %v674_v23 = vmul.f32 %v2757_v9, %v2433_v44  ;;  %v675_v17 = vmul.f32 %v2759_v59, %v2593_v40  ;;  %v638_v5 = vperm.slane %v631_v11, 0 }
 0x1a2   : > { %v639_v6 = vperm.slane %v631_v11, 1  ;;  %v2863_v21 = vadd.f32 %v678_v34, %v2475_v61  ;;  %v2866_v7 = vadd.f32 %v679_v36, %v2632_v51  ;;  %v2872_v32 = vadd.f32 %v677_v24, %v2614_v27 }
 0x1a3   : > { %v2875_v60 = vadd.f32 %v674_v23, %v2433_v44  ;;  %v2878_v54 = vadd.f32 %v675_v17, %v2593_v40  ;;  %v680_v40 = vmul.f32 %v2757_v9, %v2501_v8  ;;  %v681_v22 = vmul.f32 %v2759_v59, %v4236_v46  ;;  %v4241_v17 = vld [vmem:[#allocation11_spill] sm:$0xff] }
 0x1a4   : > { %v685_v61 = vmul.f32 %v639_v6, %v2585_v15  ;;  %v820_v51 = vadd.f32 %v2866_v7, %v2863_v21 }
 0x1a5   : > { %v814_v44 = vadd.f32 %v2878_v54, %v2875_v60  ;;  %v2907_v9 = vadd.f32 %v680_v40, %v2501_v8  ;;  %v2910_v59 = vadd.f32 %v681_v22, %v4236_v46  ;;  %v4240_v8 = vld [vmem:[#allocation28_spill] sm:$0xff] }
 0x1a6   : > { %803 = vadd.xlane.f32.xlu2 %v802_v25  ;;  %800 = vadd.xlane.f32.xlu1 %v799_v48  ;;  %v2869_v25 = vadd.f32 %v676_v26, %v2455_v53  ;;  %v684_v48 = vmul.f32 %v638_v5, %v2419_v38  ;;  %v683_v53 = vmul.f32 %v639_v6, %v2569_v0  ;;  %v4238_v26 = vld [vmem:[#allocation30_spill] sm:$0xff] }
 0x1a7   : > { %797 = vadd.xlane.f32.xlu0 %v796_v47  ;;  %v682_v47 = vmul.f32 %v638_v5, %v2416_v37  ;;  %v2898_v11 = vadd.f32 %v685_v61, %v2585_v15  ;;  %v4237_v15 = vld [vmem:[#allocation16_spill] sm:$0xff]  ;;  %v689_v23 = vmul.f32 %v639_v6, %v4240_v8  ;;  %v4242_v61 = vld [vmem:[#allocation25_spill] sm:$0xff] }
 0x1a8   : > { %v817_v27 = vadd.f32 %v2872_v32, %v2869_v25  ;;  %v2895_v57 = vadd.f32 %v684_v48, %v2419_v38  ;;  %v690_v36 = vmul.f32 %v638_v5, %v4237_v15  ;;  %v686_v48 = vmul.f32 %v638_v5, %v4241_v17 }
 0x1a9   : > { %v2901_v34 = vadd.f32 %v682_v47, %v2416_v37  ;;  %v691_v37 = vmul.f32 %v639_v6, %v4238_v26  ;;  %v632_v47 = vsel %vm489_vm3, %v2708_v45, %v2706_v19  ;;  %v2937_v40 = vadd.f32 %v689_v23, %v4240_v8  ;;  %v4248_v23 = vld [vmem:[#allocation33_spill] sm:$0xff] }
 0x1aa   : > { %v2940_v46 = vadd.f32 %v686_v48, %v4241_v17  ;;  %v697_v45 = vmul.f32 %v639_v6, %v2668_v3  ;;  %v693_v17 = vmul.f32 %v639_v6, %v4248_v23 }
 0x1ab   : > { %4244 = vst [vmem:[#allocation16_spill] sm:$0xff] %v2937_v40 }
 0x1ae   : > { %812 = vadd.xlane.f32.xlu2 %v811_v63  ;;  %809 = vadd.xlane.f32.xlu1 %v808_v29  ;;  %v2904_v63 = vadd.f32 %v683_v53, %v2569_v0  ;;  %v829_v29 = vadd.f32 %v2898_v11, %v2895_v57  ;;  %v823_v0 = vadd.f32 %v2910_v59, %v2907_v9 }
 0x1af   : > { %806 = vadd.xlane.f32.xlu0 %v805_v35  ;;  %v4239_v35 = vld [vmem:[#allocation12_spill] sm:$0xff]  ;;  %v2928_v53 = vadd.f32 %v690_v36, %v4237_v15  ;;  %v4246_v36 = vld [vmem:[#allocation19_spill] sm:$0xff] }
 0x1b0   : > { %v826_v38 = vadd.f32 %v2904_v63, %v2901_v34  ;;  %v688_v24 = vmul.f32 %v638_v5, %v4239_v35 }
 0x1b6   : > { %821 = vadd.xlane.f32.xlu2 %v820_v51  ;;  %818 = vadd.xlane.f32.xlu1 %v817_v27  ;;  %v687_v51 = vmul.f32 %v639_v6, %v4242_v61  ;;  %v2931_v27 = vadd.f32 %v691_v37, %v4238_v26  ;;  %v694_v26 = vmul.f32 %v638_v5, %v4246_v36 }
 0x1b7   : > { %815 = vadd.xlane.f32.xlu0 %v814_v44  ;;  %v2934_v44 = vadd.f32 %v688_v24, %v4239_v35  ;;  %v695_v37 = vmul.f32 %v639_v6, %v2658_v10  ;;  %v2973_v6 = vadd.f32 %v693_v17, %v4248_v23 }
 0x1b8   : > { %v2943_v22 = vadd.f32 %v687_v51, %v4242_v61  ;;  %v838_v15 = vadd.f32 %v2931_v27, %v2928_v53  ;;  %v2961_v61 = vadd.f32 %v697_v45, %v2668_v3 }
 0x1b9   : > { %4243 = vst [vmem:[#allocation32_spill] sm:$0xff] %v2934_v44  ;;  %v835_v35 = vadd.f32 %v2937_v40, %v2934_v44  ;;  %v2964_v40 = vadd.f32 %v694_v26, %v4246_v36  ;;  %v2967_v44 = vadd.f32 %v695_v37, %v2658_v10  ;;  %v4257_v36 = vld [vmem:[#allocation14_spill] sm:$0xff]  ;;  %v4258_v37 = vld [vmem:[#allocation27_spill] sm:$0xff] }
 0x1ba   : > { %v832_v24 = vadd.f32 %v2943_v22, %v2940_v46  ;;  %4250 = vst [vmem:[#allocation12_spill] sm:$0xff] %v2961_v61 }
 0x1bb   : > { %4251 = vst [vmem:[#allocation28_spill] sm:$0xff] %v2964_v40  ;;  %v844_v3 = vadd.f32 %v2967_v44, %v2964_v40 }
 0x1bc   : > { %4252 = vst [vmem:[#allocation11_spill] sm:$0xff] %v2967_v44 }
 0x1be   : > { %830 = vadd.xlane.f32.xlu2 %v829_v29  ;;  %827 = vadd.xlane.f32.xlu1 %v826_v38  ;;  %v4245_v29 = vld [vmem:[#allocation22_spill] sm:$0xff]  ;;  %v633_v38 = vrot.slane %v632_v47, 3 }
 0x1bf   : > { %824 = vadd.xlane.f32.xlu0 %v823_v0  ;;  %v696_v19 = vmul.f32 %v638_v5, %v4245_v29  ;;  %v4247_v0 = vld [vmem:[#allocation18_spill] sm:$0xff]  ;;  %4254 = vst [vmem:[#allocation22_spill] sm:$0xff] %v2973_v6 }
 0x1c0   : > { %v692_v8 = vmul.f32 %v638_v5, %v4247_v0  ;;  %v640_v51 = vperm.slane %v633_v38, 0  ;;  %v641_v47 = vperm.slane %v633_v38, 1  ;;  %v4256_v38 = vld [vmem:[#allocation29_spill] sm:$0xff] }
 0x1c1   : > { %v2958_v48 = vadd.f32 %v696_v19, %v4245_v29  ;;  %v4255_v19 = vld [vmem:[#allocation15_spill] sm:$0xff] }
 0x1c2   : > { %v2970_v5 = vadd.f32 %v692_v8, %v4247_v0  ;;  %v702_v45 = vmul.f32 %v640_v51, %v4255_v19  ;;  %v700_v26 = vmul.f32 %v640_v51, %v4257_v36  ;;  %v4260_v8 = vld [vmem:[#allocation26_spill] sm:$0xff] }
 0x1c3   : > { %4249 = vst [vmem:[#allocation30_spill] sm:$0xff] %v2958_v48  ;;  %v847_v29 = vadd.f32 %v2961_v61, %v2958_v48  ;;  %v699_v23 = vmul.f32 %v641_v47, %v4260_v8 }
 0x1c4   : > { %4253 = vst [vmem:[#allocation25_spill] sm:$0xff] %v2970_v5  ;;  %v841_v10 = vadd.f32 %v2973_v6, %v2970_v5  ;;  %v2988_v17 = vadd.f32 %v702_v45, %v4255_v19  ;;  %v2994_v40 = vadd.f32 %v700_v26, %v4257_v36  ;;  %v4267_v45 = vld [vmem:[#allocation35_spill] sm:$0xff]  ;;  %v4269_v36 = vld [vmem:[#allocation34_spill] sm:$0xff] }
 0x1c5   : > { %v3003_v61 = vadd.f32 %v699_v23, %v4260_v8  ;;  %v707_v26 = vmul.f32 %v641_v47, %v4269_v36  ;;  %v4271_v8 = vld [vmem:[#allocation31_spill] sm:$0xff] }
 0x1c6   : > { %839 = vadd.xlane.f32.xlu2 %v838_v15  ;;  %836 = vadd.xlane.f32.xlu1 %v835_v35  ;;  %v703_v15 = vmul.f32 %v641_v47, %v4256_v38  ;;  %v701_v35 = vmul.f32 %v641_v47, %v4258_v37  ;;  %4261 = vst [vmem:[#allocation19_spill] sm:$0xff] %v2988_v17 }
 0x1c7   : > { %833 = vadd.xlane.f32.xlu0 %v832_v24  ;;  %v4259_v24 = vld [vmem:[#allocation13_spill] sm:$0xff]  ;;  %4263 = vst [vmem:[#allocation33_spill] sm:$0xff] %v2994_v40  ;;  %v705_v23 = vmul.f32 %v641_v47, %v4271_v8 }
 0x1c8   : > { %v698_v0 = vmul.f32 %v640_v51, %v4259_v24  ;;  %v2991_v44 = vadd.f32 %v703_v15, %v4256_v38  ;;  %v2997_v6 = vadd.f32 %v701_v35, %v4258_v37  ;;  %4265 = vst [vmem:[#allocation29_spill] sm:$0xff] %v3003_v61  ;;  %v709_v38 = vmul.f32 %v641_v47, %v4267_v45  ;;  %v4268_v15 = vld [vmem:[#allocation20_spill] sm:$0xff] }
 0x1ca   : > { %4262 = vst [vmem:[#allocation18_spill] sm:$0xff] %v2991_v44  ;;  %v3000_v5 = vadd.f32 %v698_v0, %v4259_v24  ;;  %v856_v19 = vadd.f32 %v2991_v44, %v2988_v17  ;;  %v853_v37 = vadd.f32 %v2997_v6, %v2994_v40  ;;  %v4270_v24 = vld [vmem:[#allocation17_spill] sm:$0xff]  ;;  %v3021_v17 = vadd.f32 %v709_v38, %v4267_v45 }
 0x1cb   : > { %4264 = vst [vmem:[#allocation15_spill] sm:$0xff] %v2997_v6  ;;  %v704_v0 = vmul.f32 %v640_v51, %v4270_v24  ;;  %v3027_v6 = vadd.f32 %v707_v26, %v4269_v36  ;;  %v4275_v26 = vld [vmem:[#allocation36_spill] sm:$0xff] }
 0x1cc   : > { %v850_v35 = vadd.f32 %v3003_v61, %v3000_v5  ;;  %v3033_v61 = vadd.f32 %v705_v23, %v4271_v8 }
 0x1cd   : > { %v3030_v40 = vadd.f32 %v704_v0, %v4270_v24 }
 0x1ce   : > { %848 = vadd.xlane.f32.xlu2 %v847_v29  ;;  %845 = vadd.xlane.f32.xlu1 %v844_v3  ;;  %v4266_v29 = vld [vmem:[#allocation21_spill] sm:$0xff] }
 0x1cf   : > { %842 = vadd.xlane.f32.xlu0 %v841_v10  ;;  %v708_v3 = vmul.f32 %v640_v51, %v4266_v29  ;;  %v706_v10 = vmul.f32 %v640_v51, %v4268_v15 }
 0x1d1   : > { %v3018_v44 = vadd.f32 %v708_v3, %v4266_v29  ;;  %v3024_v48 = vadd.f32 %v706_v10, %v4268_v15  ;;  %v4272_v29 = vld [vmem:[#allocation24_spill] sm:$0xff]  ;;  %v859_v15 = vadd.f32 %v3033_v61, %v3030_v40  ;;  %v4274_v10 = vld [vmem:[#allocation23_spill] sm:$0xff] }
 0x1d2   : > { %v712_v3 = vmul.f32 %v640_v51, %v4272_v29  ;;  %v710_v36 = vmul.f32 %v640_v51, %v4274_v10 }
 0x1d3   : > { %v862_v38 = vadd.f32 %v3027_v6, %v3024_v48 }
 0x1d4   : > { %v3046_v24 = vadd.f32 %v712_v3, %v4272_v29  ;;  %v3052_v8 = vadd.f32 %v710_v36, %v4274_v10 }
 0x1d6   : > { %857 = vadd.xlane.f32.xlu2 %v856_v19  ;;  %854 = vadd.xlane.f32.xlu1 %v853_v37  ;;  %v865_v19 = vadd.f32 %v3021_v17, %v3018_v44  ;;  %v4273_v37 = vld [vmem:[#allocation37_spill] sm:$0xff] }
 0x1d7   : > { %851 = vadd.xlane.f32.xlu0 %v850_v35  ;;  %v713_v45 = vmul.f32 %v641_v47, %v4273_v37  ;;  %v711_v35 = vmul.f32 %v641_v47, %v4275_v26 }
 0x1d9   : > { %v3049_v0 = vadd.f32 %v713_v45, %v4273_v37  ;;  %v3055_v23 = vadd.f32 %v711_v35, %v4275_v26 }
 0x1db   : > { %4276 = vst [vmem:[#allocation14_spill] sm:$0xff] %v3049_v0  ;;  %v871_v51 = vadd.f32 %v3049_v0, %v3046_v24  ;;  %v868_v47 = vadd.f32 %v3055_v23, %v3052_v8 }
 0x1de   : > { %866 = vadd.xlane.f32.xlu2 %v865_v19  ;;  %863 = vadd.xlane.f32.xlu1 %v862_v38  ;;  %v2180_v19 = vmov 256.0  }
 0x1df   : > { %860 = vadd.xlane.f32.xlu0 %v859_v15  ;;  %1987 = vrcp.f32 %v2180_v19 }
 0x1e5   : > { %v1988_v29 = vpop.eup %1987 }
 0x1e6   : > { %872 = vadd.xlane.f32.xlu1 %v871_v51  ;;  %v875_v3 = vmul.f32 256.0, %v1988_v29  ;;  %vm879_vm14 = vweird.f32 %v1988_v29 }
 0x1e7   : > { %869 = vadd.xlane.f32.xlu0 %v868_v47 }
 0x1e8   : > { %v876_v37 = vsub.f32 1.0, %v875_v3 }
 0x1ea   : > { %v877_v45 = vmul.f32 %v1988_v29, %v876_v37 }
 0x1ec   : > { %v878_v38 = vadd.f32 %v1988_v29, %v877_v45 }
 0x1ee   : > { %v3061_v15 = vsel %vm879_vm14, %v1988_v29, %v878_v38 }
 0x209   : > { %v792_v10 = vpop.xlane.xlu2 %791  ;;  %v786_v36 = vpop.xlane.xlu1 %785 }
 0x20a   : > { %v780_v26 = vpop.xlane.xlu0 %779  ;;  %v883_v35 = vmul.f32 %v3061_v15, %v786_v36 }
 0x20b   : > { %v881_v0 = vmul.f32 %v3061_v15, %v780_v26 }
 0x20c   : > { %v3066_v51 = vsub.f32 %v2730_v62, %v883_v35  ;;  %v3069_v47 = vsub.f32 %v2733_v52, %v883_v35 }
 0x20d   : > { %v3072_v19 = vsub.f32 %v2736_v42, %v881_v0  ;;  %v3075_v3 = vsub.f32 %v2739_v56, %v881_v0 }
 0x20e   : > { %4277 = vst [vmem:[#allocation27_spill] sm:$0xff] %v3069_v47  ;;  %v981_v29 = vmul.f32 %v3066_v51, %v3066_v51  ;;  %v982_v37 = vmul.f32 %v3069_v47, %v3069_v47 }
 0x20f   : > { %4278 = vst [vmem:[#allocation13_spill] sm:$0xff] %v3072_v19  ;;  %v977_v45 = vmul.f32 %v3072_v19, %v3072_v19  ;;  %v978_v62 = vmul.f32 %v3075_v3, %v3075_v3 }
 0x210   : > { %4279 = vst [vmem:[#allocation26_spill] sm:$0xff] %v3075_v3  ;;  %v1047_v38 = vadd.f32 %v982_v37, %v981_v29 }
 0x211   : > { %v795_v52 = vpop.xlane.xlu2 %794  ;;  %v1041_v36 = vadd.f32 %v978_v62, %v977_v45  ;;  %v789_v26 = vpop.xlane.xlu1 %788  ;;  %v885_v62 = vmul.f32 %v3061_v15, %v792_v10 }
 0x212   : > { %v886_v42 = vmul.f32 %v3061_v15, %v795_v52  ;;  %v783_v56 = vpop.xlane.xlu0 %782  ;;  %v884_v0 = vmul.f32 %v3061_v15, %v789_v26  ;;  %1048 = vadd.xlane.f32.xlu1 %v1047_v38 }
 0x213   : > { %v882_v35 = vmul.f32 %v3061_v15, %v783_v56  ;;  %1042 = vadd.xlane.f32.xlu2 %v1041_v36  ;;  %v3123_v26 = vsub.f32 %v2725_v2, %v885_v62 }
 0x214   : > { %v3089_v47 = vsub.f32 %v2752_v12, %v886_v42  ;;  %v3092_v19 = vsub.f32 %v2755_v49, %v886_v42  ;;  %v3095_v3 = vsub.f32 %v2762_v1, %v884_v0  ;;  %v3098_v29 = vsub.f32 %v2765_v20, %v884_v0 }
 0x215   : > { %v3101_v37 = vsub.f32 %v2768_v28, %v882_v35  ;;  %v3104_v45 = vsub.f32 %v2771_v30, %v882_v35  ;;  %v3120_v42 = vsub.f32 %v2722_v41, %v885_v62 }
 0x216   : > { %4280 = vst [vmem:[#allocation21_spill] sm:$0xff] %v3098_v29  ;;  %v987_v12 = vmul.f32 %v3089_v47, %v3089_v47  ;;  %v988_v49 = vmul.f32 %v3092_v19, %v3092_v19  ;;  %v983_v1 = vmul.f32 %v3095_v3, %v3095_v3  ;;  %v984_v20 = vmul.f32 %v3098_v29, %v3098_v29 }
 0x217   : > { %4281 = vst [vmem:[#allocation35_spill] sm:$0xff] %v3104_v45  ;;  %v979_v28 = vmul.f32 %v3101_v37, %v3101_v37  ;;  %v980_v30 = vmul.f32 %v3104_v45, %v3104_v45 }
 0x218   : > { %v1056_v52 = vadd.f32 %v988_v49, %v987_v12  ;;  %v1050_v38 = vadd.f32 %v984_v20, %v983_v1 }
 0x219   : > { %v804_v10 = vpop.xlane.xlu2 %803  ;;  %v1044_v36 = vadd.f32 %v980_v30, %v979_v28  ;;  %v801_v0 = vpop.xlane.xlu1 %800 }
 0x21a   : > { %v889_v56 = vmul.f32 %v3061_v15, %v804_v10  ;;  %v798_v35 = vpop.xlane.xlu0 %797  ;;  %1057 = vadd.xlane.f32.xlu1 %v1056_v52  ;;  %v888_v41 = vmul.f32 %v3061_v15, %v801_v0 }
 0x21b   : > { %v887_v29 = vmul.f32 %v3061_v15, %v798_v35  ;;  %1051 = vadd.xlane.f32.xlu2 %v1050_v38  ;;  %1045 = vadd.xlane.f32.xlu0 %v1044_v36 }
 0x21c   : > { %v3128_v45 = vsub.f32 %v2788_v55, %v889_v56  ;;  %v3131_v12 = vsub.f32 %v2791_v31, %v889_v56  ;;  %v985_v55 = vmul.f32 %v3120_v42, %v3120_v42  ;;  %v986_v31 = vmul.f32 %v3123_v26, %v3123_v26 }
 0x21d   : > { %v3135_v2 = vsub.f32 %v2800_v33, %v887_v29  ;;  %v3138_v62 = vsub.f32 %v2803_v58, %v887_v29  ;;  %v3153_v29 = vsub.f32 %v2794_v39, %v888_v41  ;;  %v3156_v52 = vsub.f32 %v2797_v50, %v888_v41 }
 0x21e   : > { %v993_v49 = vmul.f32 %v3128_v45, %v3128_v45  ;;  %v994_v1 = vmul.f32 %v3131_v12, %v3131_v12  ;;  %v1053_v56 = vadd.f32 %v986_v31, %v985_v55 }
 0x21f   : > { %v989_v20 = vmul.f32 %v3135_v2, %v3135_v2  ;;  %v990_v33 = vmul.f32 %v3138_v62, %v3138_v62  ;;  %v991_v41 = vmul.f32 %v3153_v29, %v3153_v29 }
 0x220   : > { %v1065_v58 = vadd.f32 %v994_v1, %v993_v49 }
 0x221   : > { %v813_v28 = vpop.xlane.xlu2 %812  ;;  %v1059_v30 = vadd.f32 %v990_v33, %v989_v20  ;;  %v810_v38 = vpop.xlane.xlu1 %809 }
 0x222   : > { %v892_v10 = vmul.f32 %v3061_v15, %v813_v28  ;;  %v807_v36 = vpop.xlane.xlu0 %806  ;;  %1066 = vadd.xlane.f32.xlu1 %v1065_v58  ;;  %v891_v1 = vmul.f32 %v3061_v15, %v810_v38 }
 0x223   : > { %v890_v0 = vmul.f32 %v3061_v15, %v807_v36  ;;  %1060 = vadd.xlane.f32.xlu2 %v1059_v30  ;;  %1054 = vadd.xlane.f32.xlu0 %v1053_v56 }
 0x224   : > { %v3161_v35 = vsub.f32 %v2827_v18, %v892_v10  ;;  %v3164_v39 = vsub.f32 %v2830_v14, %v892_v10  ;;  %v992_v14 = vmul.f32 %v3156_v52, %v3156_v52  ;;  %v3186_v58 = vsub.f32 %v2833_v16, %v891_v1 }
 0x225   : > { %v3167_v49 = vsub.f32 %v2839_v43, %v890_v0  ;;  %v3170_v50 = vsub.f32 %v2842_v13, %v890_v0  ;;  %v3189_v28 = vsub.f32 %v2836_v4, %v891_v1 }
 0x226   : > { %v999_v55 = vmul.f32 %v3161_v35, %v3161_v35  ;;  %v1000_v18 = vmul.f32 %v3164_v39, %v3164_v39  ;;  %v1062_v36 = vadd.f32 %v992_v14, %v991_v41 }
 0x227   : > { %v995_v43 = vmul.f32 %v3167_v49, %v3167_v49  ;;  %v996_v13 = vmul.f32 %v3170_v50, %v3170_v50 }
 0x228   : > { %v1074_v31 = vadd.f32 %v1000_v18, %v999_v55 }
 0x229   : > { %v822_v20 = vpop.xlane.xlu2 %821  ;;  %v1068_v33 = vadd.f32 %v996_v13, %v995_v43  ;;  %v819_v10 = vpop.xlane.xlu1 %818 }
 0x22a   : > { %v895_v30 = vmul.f32 %v3061_v15, %v822_v20  ;;  %v816_v38 = vpop.xlane.xlu0 %815  ;;  %1075 = vadd.xlane.f32.xlu1 %v1074_v31  ;;  %v894_v16 = vmul.f32 %v3061_v15, %v819_v10 }
 0x22b   : > { %v893_v56 = vmul.f32 %v3061_v15, %v816_v38  ;;  %1069 = vadd.xlane.f32.xlu2 %v1068_v33  ;;  %1063 = vadd.xlane.f32.xlu0 %v1062_v36 }
 0x22c   : > { %v3194_v0 = vsub.f32 %v2863_v21, %v895_v30  ;;  %v3197_v55 = vsub.f32 %v2866_v7, %v895_v30  ;;  %v997_v21 = vmul.f32 %v3186_v58, %v3186_v58  ;;  %v998_v7 = vmul.f32 %v3189_v28, %v3189_v28 }
 0x22d   : > { %v3201_v4 = vsub.f32 %v2875_v60, %v893_v56  ;;  %v3204_v1 = vsub.f32 %v2878_v54, %v893_v56  ;;  %v3219_v43 = vsub.f32 %v2869_v25, %v894_v16  ;;  %v3222_v20 = vsub.f32 %v2872_v32, %v894_v16 }
 0x22e   : > { %v1005_v41 = vmul.f32 %v3194_v0, %v3194_v0  ;;  %v1006_v18 = vmul.f32 %v3197_v55, %v3197_v55  ;;  %v1071_v38 = vadd.f32 %v998_v7, %v997_v21 }
 0x22f   : > { %v1001_v14 = vmul.f32 %v3201_v4, %v3201_v4  ;;  %v1002_v60 = vmul.f32 %v3204_v1, %v3204_v1  ;;  %4282 = vst [vmem:[#allocation20_spill] sm:$0xff] %v3222_v20  ;;  %v1003_v16 = vmul.f32 %v3219_v43, %v3219_v43 }
 0x230   : > { %v1083_v54 = vadd.f32 %v1006_v18, %v1005_v41 }
 0x231   : > { %v831_v13 = vpop.xlane.xlu2 %830  ;;  %v1077_v31 = vadd.f32 %v1002_v60, %v1001_v14  ;;  %v828_v30 = vpop.xlane.xlu1 %827 }
 0x232   : > { %v898_v33 = vmul.f32 %v3061_v15, %v831_v13  ;;  %v825_v10 = vpop.xlane.xlu0 %824  ;;  %1084 = vadd.xlane.f32.xlu1 %v1083_v54  ;;  %v897_v18 = vmul.f32 %v3061_v15, %v828_v30 }
 0x233   : > { %v896_v36 = vmul.f32 %v3061_v15, %v825_v10  ;;  %1078 = vadd.xlane.f32.xlu2 %v1077_v31  ;;  %1072 = vadd.xlane.f32.xlu0 %v1071_v38 }
 0x234   : > { %v3227_v56 = vsub.f32 %v2895_v57, %v898_v33  ;;  %v3230_v25 = vsub.f32 %v2898_v11, %v898_v33  ;;  %v1004_v11 = vmul.f32 %v3222_v20, %v3222_v20  ;;  %v3252_v54 = vsub.f32 %v2901_v34, %v897_v18 }
 0x235   : > { %v3233_v41 = vsub.f32 %v2907_v9, %v896_v36  ;;  %v3236_v32 = vsub.f32 %v2910_v59, %v896_v36  ;;  %v3255_v13 = vsub.f32 %v2904_v63, %v897_v18 }
 0x236   : > { %v1011_v21 = vmul.f32 %v3227_v56, %v3227_v56  ;;  %v1012_v57 = vmul.f32 %v3230_v25, %v3230_v25  ;;  %4283 = vst [vmem:[#allocation34_spill] sm:$0xff] %v3252_v54  ;;  %v1080_v10 = vadd.f32 %v1004_v11, %v1003_v16 }
 0x237   : > { %v1007_v9 = vmul.f32 %v3233_v41, %v3233_v41  ;;  %v1008_v59 = vmul.f32 %v3236_v32, %v3236_v32  ;;  %4284 = vst [vmem:[#allocation17_spill] sm:$0xff] %v3255_v13 }
 0x238   : > { %v1092_v7 = vadd.f32 %v1012_v57, %v1011_v21  ;;  %v1010_v57 = vmul.f32 %v3255_v13, %v3255_v13 }
 0x239   : > { %v840_v14 = vpop.xlane.xlu2 %839  ;;  %v1086_v60 = vadd.f32 %v1008_v59, %v1007_v9  ;;  %v837_v33 = vpop.xlane.xlu1 %836  ;;  %v4289_v9 = vld [vmem:[#allocation32_spill] sm:$0xff] }
 0x23a   : > { %v901_v31 = vmul.f32 %v3061_v15, %v840_v14  ;;  %v834_v30 = vpop.xlane.xlu0 %833  ;;  %1093 = vadd.xlane.f32.xlu1 %v1092_v7  ;;  %v900_v34 = vmul.f32 %v3061_v15, %v837_v33 }
 0x23b   : > { %v899_v38 = vmul.f32 %v3061_v15, %v834_v30  ;;  %1087 = vadd.xlane.f32.xlu2 %v1086_v60  ;;  %1081 = vadd.xlane.f32.xlu0 %v1080_v10  ;;  %v4291_v60 = vld [vmem:[#allocation16_spill] sm:$0xff] }
 0x23c   : > { %v3260_v36 = vsub.f32 %v2928_v53, %v901_v31  ;;  %v3263_v21 = vsub.f32 %v2931_v27, %v901_v31  ;;  %v1009_v27 = vmul.f32 %v3252_v54, %v3252_v54  ;;  %v3285_v59 = vsub.f32 %v4289_v9, %v900_v34  ;;  %v4295_v9 = vld [vmem:[#allocation12_spill] sm:$0xff] }
 0x23d   : > { %v3267_v63 = vsub.f32 %v2940_v46, %v899_v38  ;;  %v3270_v18 = vsub.f32 %v2943_v22, %v899_v38  ;;  %v3288_v31 = vsub.f32 %v4291_v60, %v900_v34  ;;  %v4297_v34 = vld [vmem:[#allocation25_spill] sm:$0xff] }
 0x23e   : > { %4285 = vst [vmem:[#allocation31_spill] sm:$0xff] %v3260_v36  ;;  %v1017_v16 = vmul.f32 %v3260_v36, %v3260_v36  ;;  %v1018_v53 = vmul.f32 %v3263_v21, %v3263_v21  ;;  %v1089_v38 = vadd.f32 %v1010_v57, %v1009_v27  ;;  %v4299_v57 = vld [vmem:[#allocation22_spill] sm:$0xff] }
 0x23f   : > { %4286 = vst [vmem:[#allocation24_spill] sm:$0xff] %v3263_v21  ;;  %v1013_v46 = vmul.f32 %v3267_v63, %v3267_v63  ;;  %v1014_v22 = vmul.f32 %v3270_v18, %v3270_v18  ;;  %v1016_v60 = vmul.f32 %v3288_v31, %v3288_v31 }
 0x240   : > { %4287 = vst [vmem:[#allocation37_spill] sm:$0xff] %v3267_v63  ;;  %v1101_v11 = vadd.f32 %v1018_v53, %v1017_v16  ;;  %v4293_v16 = vld [vmem:[#allocation30_spill] sm:$0xff] }
 0x241   : > { %4288 = vst [vmem:[#allocation23_spill] sm:$0xff] %v3270_v18  ;;  %v849_v7 = vpop.xlane.xlu2 %848  ;;  %v1095_v14 = vadd.f32 %v1014_v22, %v1013_v46  ;;  %v846_v30 = vpop.xlane.xlu1 %845  ;;  %v1015_v22 = vmul.f32 %v3285_v59, %v3285_v59 }
 0x242   : > { %4290 = vst [vmem:[#allocation36_spill] sm:$0xff] %v3285_v59  ;;  %v904_v33 = vmul.f32 %v3061_v15, %v849_v7  ;;  %v843_v10 = vpop.xlane.xlu0 %842  ;;  %1102 = vadd.xlane.f32.xlu1 %v1101_v11  ;;  %v903_v11 = vmul.f32 %v3061_v15, %v846_v30 }
 0x243   : > { %4292 = vst [vmem:[#allocation32_spill] sm:$0xff] %v3288_v31  ;;  %v902_v13 = vmul.f32 %v3061_v15, %v843_v10  ;;  %1096 = vadd.xlane.f32.xlu2 %v1095_v14  ;;  %1090 = vadd.xlane.f32.xlu0 %v1089_v38 }
 0x244   : > { %v3295_v53 = vsub.f32 %v4293_v16, %v904_v33  ;;  %v3298_v54 = vsub.f32 %v4295_v9, %v904_v33 }
 0x245   : > { %v3307_v27 = vsub.f32 %v4297_v34, %v902_v13  ;;  %v3310_v46 = vsub.f32 %v4299_v57, %v902_v13 }
 0x246   : > { %4294 = vst [vmem:[#allocation16_spill] sm:$0xff] %v3295_v53  ;;  %v1023_v7 = vmul.f32 %v3295_v53, %v3295_v53  ;;  %v1024_v14 = vmul.f32 %v3298_v54, %v3298_v54 }
 0x247   : > { %4296 = vst [vmem:[#allocation30_spill] sm:$0xff] %v3298_v54  ;;  %v1019_v13 = vmul.f32 %v3307_v27, %v3307_v27  ;;  %v1020_v33 = vmul.f32 %v3310_v46, %v3310_v46 }
 0x248   : > { %4298 = vst [vmem:[#allocation12_spill] sm:$0xff] %v3307_v27  ;;  %v1110_v10 = vadd.f32 %v1024_v14, %v1023_v7 }
 0x249   : > { %4300 = vst [vmem:[#allocation25_spill] sm:$0xff] %v3310_v46  ;;  %v858_v38 = vpop.xlane.xlu2 %857  ;;  %v1104_v30 = vadd.f32 %v1020_v33, %v1019_v13 }
 0x24a   : > { %2094 = shalt.err (!%p2091_p1)  }
 0x24b   : > { %s2181_s8 = smov 2048   ;;  %s2182_s11 = smov 4096   ;;  %v4301_v16 = vld [vmem:[#allocation28_spill] sm:$0xff]  ;;  %v4303_v34 = vld [vmem:[#allocation11_spill] sm:$0xff]  ;;  %v907_v7 = vmul.f32 %v3061_v15, %v858_v38  ;;  %v855_v14 = vpop.xlane.xlu1 %854  ;;  %v852_v13 = vpop.xlane.xlu0 %851  ;;  %v1098_v33 = vadd.f32 %v1016_v60, %v1015_v22  ;;  %1111 = vadd.xlane.f32.xlu1 %v1110_v10  ;;  %1105 = vadd.xlane.f32.xlu2 %v1104_v30  ;;  %v4307_v27 = vld [vmem:[#allocation18_spill] sm:$0xff] }
 0x24c   : > { %s2183_s16 = smov 128   ;;  %v3335_v9 = vsub.f32 %v4301_v16, %v903_v11  ;;  %v3338_v57 = vsub.f32 %v4303_v34, %v903_v11  ;;  %v905_v31 = vmul.f32 %v3061_v15, %v852_v13  ;;  %v4305_v59 = vld [vmem:[#allocation19_spill] sm:$0xff]  ;;  %v906_v16 = vmul.f32 %v3061_v15, %v855_v14  ;;  %v4310_v38 = vld [vmem:[#allocation29_spill] sm:$0xff]  ;;  %v4329_v63 = vld [vmem:[#allocation26_spill] sm:$0xff] }
 0x24d   : > { %261 = dma.hbm_to_vmem [thread:$0]  %s255_s29, 8192, %s257_s17, [#allocation2], %s2181_s8, %s2182_s11, %s2183_s16  ;;  %v3343_v46 = vsub.f32 %v4305_v59, %v907_v7  ;;  %v3346_v54 = vsub.f32 %v4307_v27, %v907_v7  ;;  %1099 = vadd.xlane.f32.xlu0 %v1098_v33  ;;  %v4312_v30 = vld [vmem:[#allocation33_spill] sm:$0xff]  ;;  %v4314_v33 = vld [vmem:[#allocation15_spill] sm:$0xff] }
 0x24e   : > { %4302 = vst [vmem:[#allocation22_spill] sm:$0xff] %v3335_v9  ;;  %v3350_v11 = vsub.f32 %v3000_v5, %v905_v31  ;;  %v3353_v34 = vsub.f32 %v4310_v38, %v905_v31  ;;  %v1021_v59 = vmul.f32 %v3335_v9, %v3335_v9  ;;  %v1022_v27 = vmul.f32 %v3338_v57, %v3338_v57 }
 0x24f   : > { %4304 = vst [vmem:[#allocation28_spill] sm:$0xff] %v3338_v57  ;;  %v1029_v22 = vmul.f32 %v3343_v46, %v3343_v46  ;;  %v1030_v60 = vmul.f32 %v3346_v54, %v3346_v54  ;;  %v3368_v7 = vsub.f32 %v4312_v30, %v906_v16  ;;  %v3371_v38 = vsub.f32 %v4314_v33, %v906_v16 }
 0x250   : > { %4306 = vst [vmem:[#allocation11_spill] sm:$0xff] %v3343_v46  ;;  %v1025_v10 = vmul.f32 %v3350_v11, %v3350_v11  ;;  %v1026_v5 = vmul.f32 %v3353_v34, %v3353_v34  ;;  %v1107_v57 = vadd.f32 %v1022_v27, %v1021_v59 }
 0x251   : > { %4308 = vst [vmem:[#allocation19_spill] sm:$0xff] %v3346_v54  ;;  %v1119_v31 = vadd.f32 %v1030_v60, %v1029_v22  ;;  %v867_v14 = vpop.xlane.xlu2 %866  ;;  %v1027_v59 = vmul.f32 %v3368_v7, %v3368_v7 }
 0x252   : > { %4309 = vst [vmem:[#allocation18_spill] sm:$0xff] %v3350_v11  ;;  %v1113_v13 = vadd.f32 %v1026_v5, %v1025_v10  ;;  %v910_v9 = vmul.f32 %v3061_v15, %v867_v14  ;;  %v4328_v11 = vld [vmem:[#allocation13_spill] sm:$0xff] }
 0x253   : > { %4311 = vst [vmem:[#allocation29_spill] sm:$0xff] %v3353_v34  ;;  %v864_v54 = vpop.xlane.xlu1 %863  ;;  %v861_v46 = vpop.xlane.xlu0 %860  ;;  %1120 = vadd.xlane.f32.xlu1 %v1119_v31 }
 0x254   : > { %4313 = vst [vmem:[#allocation33_spill] sm:$0xff] %v3368_v7  ;;  %v908_v53 = vmul.f32 %v3061_v15, %v861_v46  ;;  %1114 = vadd.xlane.f32.xlu2 %v1113_v13  ;;  %v3376_v34 = vsub.f32 %v3018_v44, %v910_v9  ;;  %v3379_v22 = vsub.f32 %v3021_v17, %v910_v9 }
 0x255   : > { %4315 = vst [vmem:[#allocation15_spill] sm:$0xff] %v3371_v38  ;;  %1108 = vadd.xlane.f32.xlu0 %v1107_v57  ;;  %v909_v46 = vmul.f32 %v3061_v15, %v864_v54  ;;  %v1028_v17 = vmul.f32 %v3371_v38, %v3371_v38 }
 0x256   : > { %4316 = vst [vmem:[#allocation38_spill] sm:$0xff] %v3376_v34  ;;  %v3382_v60 = vsub.f32 %v3030_v40, %v908_v53  ;;  %v3385_v16 = vsub.f32 %v3033_v61, %v908_v53  ;;  %v1035_v27 = vmul.f32 %v3376_v34, %v3376_v34  ;;  %v1036_v44 = vmul.f32 %v3379_v22, %v3379_v22 }
 0x257   : > { %4317 = vst [vmem:[#allocation39_spill] sm:$0xff] %v3379_v22  ;;  %v3401_v57 = vsub.f32 %v3024_v48, %v909_v46  ;;  %v3404_v54 = vsub.f32 %v3027_v6, %v909_v46  ;;  %v1116_v5 = vadd.f32 %v1028_v17, %v1027_v59  ;;  %v4327_v22 = vld [vmem:[#allocation27_spill] sm:$0xff] }
 0x258   : > { %4318 = vst [vmem:[#allocation40_spill] sm:$0xff] %v3382_v60  ;;  %v1031_v40 = vmul.f32 %v3382_v60, %v3382_v60  ;;  %v1032_v61 = vmul.f32 %v3385_v16, %v3385_v16  ;;  %v1128_v53 = vadd.f32 %v1036_v44, %v1035_v27 }
 0x259   : > { %4319 = vst [vmem:[#allocation41_spill] sm:$0xff] %v3385_v16  ;;  %v1033_v6 = vmul.f32 %v3401_v57, %v3401_v57  ;;  %v1034_v33 = vmul.f32 %v3404_v54, %v3404_v54 }
 0x25a   : > { %v1122_v9 = vadd.f32 %v1032_v61, %v1031_v40  ;;  %4320 = vst [vmem:[#allocation42_spill] sm:$0xff] %v3401_v57 }
 0x25b   : > { %4321 = vst [vmem:[#allocation43_spill] sm:$0xff] %v3404_v54  ;;  %v870_v10 = vpop.xlane.xlu0 %869  ;;  %v873_v31 = vpop.xlane.xlu1 %872  ;;  %1129 = vadd.xlane.f32.xlu1 %v1128_v53  ;;  %v1125_v17 = vadd.f32 %v1034_v33, %v1033_v6 }
 0x25c   : > { %v911_v30 = vmul.f32 %v3061_v15, %v870_v10  ;;  %1123 = vadd.xlane.f32.xlu2 %v1122_v9  ;;  %v912_v48 = vmul.f32 %v3061_v15, %v873_v31 }
 0x25d   : > { %1117 = vadd.xlane.f32.xlu0 %v1116_v5 }
 0x25e   : > { %v3408_v14 = vsub.f32 %v3052_v8, %v911_v30  ;;  %v3411_v13 = vsub.f32 %v3055_v23, %v911_v30  ;;  %v3423_v8 = vsub.f32 %v3046_v24, %v912_v48  ;;  %v4325_v23 = vld [vmem:[#allocation14_spill] sm:$0xff] }
 0x25f   : > { %v3426_v44 = vsub.f32 %v4325_v23, %v912_v48 }
 0x260   : > { %4322 = vst [vmem:[#allocation44_spill] sm:$0xff] %v3408_v14  ;;  %v1037_v59 = vmul.f32 %v3408_v14, %v3408_v14  ;;  %v1038_v46 = vmul.f32 %v3411_v13, %v3411_v13  ;;  %v1039_v40 = vmul.f32 %v3423_v8, %v3423_v8 }
 0x261   : > { %4323 = vst [vmem:[#allocation45_spill] sm:$0xff] %v3411_v13  ;;  %v1040_v61 = vmul.f32 %v3426_v44, %v3426_v44 }
 0x262   : > { %v1131_v27 = vadd.f32 %v1038_v46, %v1037_v59  ;;  %4324 = vst [vmem:[#allocation46_spill] sm:$0xff] %v3423_v8 }
 0x263   : > { %4326 = vst [vmem:[#allocation14_spill] sm:$0xff] %v3426_v44  ;;  %v1134_v53 = vadd.f32 %v1040_v61, %v1039_v40 }
 0x264   : > { %1132 = vadd.xlane.f32.xlu2 %v1131_v27 }
 0x265   : > { %1126 = vadd.xlane.f32.xlu0 %v1125_v17 }
 0x26d   : > { %1135 = vadd.xlane.f32.xlu0 %v1134_v53 }
 0x285   : > { %v1049_v9 = vpop.xlane.xlu1 %1048 }
 0x286   : > { %v1043_v10 = vpop.xlane.xlu2 %1042  ;;  %v1139_v5 = vmul.f32 %v1049_v9, %v3061_v15 }
 0x287   : > { %v1137_v24 = vmul.f32 %v1043_v10, %v3061_v15  ;;  %v1585_v10 = vld [vmem:[%s4096_s3] sm:$0x3] }
 0x288   : > { %v1171_v31 = vadd.f32 1e-05, %v1139_v5  ;;  %v1655_v5 = vld [vmem:[%s4097_s4] sm:$0x3] }
 0x289   : > { %v1169_v30 = vadd.f32 1e-05, %v1137_v24  ;;  %v3458_v54 = vperm.slane %v1655_v5, 1 }
 0x28a   : > { %1989 = vrsqrt.f32 %v1171_v31  ;;  %vm1227_vm15 = vweird.f32 %v1171_v31 }
 0x28b   : > { %1991 = vrsqrt.f32 %v1169_v30  ;;  %vm1207_vm1 = vweird.f32 %v1169_v30 }
 0x28d   : > { %v1058_v48 = vpop.xlane.xlu1 %1057 }
 0x28e   : > { %v1052_v6 = vpop.xlane.xlu2 %1051  ;;  %v1142_v33 = vmul.f32 %v1058_v48, %v3061_v15  ;;  %v1046_v46 = vpop.xlane.xlu0 %1045 }
 0x28f   : > { %v1140_v59 = vmul.f32 %v1052_v6, %v3061_v15  ;;  %v1138_v27 = vmul.f32 %v1046_v46, %v3061_v15  ;;  %v3456_v46 = vperm.slane %v1655_v5, 0 }
 0x290   : > { %v1990_v23 = vpop.eup %1989  ;;  %v3437_v17 = vadd.f32 1e-05, %v1142_v33  ;;  %v3452_v33 = vperm.slane %v1585_v10, 0 }
 0x291   : > { %v3439_v40 = vadd.f32 1e-05, %v1140_v59  ;;  %v1992_v61 = vpop.eup %1991  ;;  %v1222_v53 = vmul.f32 %v1990_v23, %v1171_v31  ;;  %v3441_v9 = vadd.f32 1e-05, %v1138_v27  ;;  %v3454_v59 = vperm.slane %v1585_v10, 1 }
 0x292   : > { %v1202_v24 = vmul.f32 %v1992_v61, %v1169_v30  ;;  %1993 = vrsqrt.f32 %v3437_v17  ;;  %vm1228_vm0 = vweird.f32 %v1990_v23  ;;  %vm1208_vm2 = vweird.f32 %v1992_v61 }
 0x293   : > { %v1223_v48 = vmul.f32 %v1990_v23, %v1222_v53  ;;  %1995 = vrsqrt.f32 %v3439_v40  ;;  %vm1257_vm3 = vweird.f32 %v3437_v17  ;;  %vm1229_vm5 = vmor %vm1227_vm15, %vm1228_vm0  ;;  %vm1237_vm10 = vweird.f32 %v3439_v40 }
 0x294   : > { %v1203_v6 = vmul.f32 %v1992_v61, %v1202_v24  ;;  %1997 = vrsqrt.f32 %v3441_v9  ;;  %vm1209_vm6 = vmor %vm1207_vm1, %vm1208_vm2  ;;  %vm1217_vm11 = vweird.f32 %v3441_v9 }
 0x295   : > { %v1224_v27 = vmul.f32 0.5, %v1223_v48  ;;  %v1067_v44 = vpop.xlane.xlu1 %1066 }
 0x296   : > { %v1061_v8 = vpop.xlane.xlu2 %1060  ;;  %v1204_v57 = vmul.f32 0.5, %v1203_v6  ;;  %v1145_v13 = vmul.f32 %v1067_v44, %v3061_v15  ;;  %v1055_v14 = vpop.xlane.xlu0 %1054 }
 0x297   : > { %v1143_v53 = vmul.f32 %v1061_v8, %v3061_v15  ;;  %v1225_v24 = vsub.f32 1.5, %v1224_v27  ;;  %v1141_v38 = vmul.f32 %v1055_v14, %v3061_v15 }
 0x298   : > { %v1994_v10 = vpop.eup %1993  ;;  %v1205_v7 = vsub.f32 1.5, %v1204_v57  ;;  %v3463_v48 = vadd.f32 1e-05, %v1145_v13 }
 0x299   : > { %v1996_v16 = vpop.eup %1995  ;;  %v1226_v5 = vmul.f32 %v1990_v23, %v1225_v24  ;;  %v1252_v6 = vmul.f32 %v1994_v10, %v3437_v17  ;;  %vm1258_vm4 = vweird.f32 %v1994_v10  ;;  %v3467_v8 = vadd.f32 1e-05, %v1143_v53 }
 0x29a   : > { %v1998_v44 = vpop.eup %1997  ;;  %v1206_v27 = vmul.f32 %v1992_v61, %v1205_v7  ;;  %v1232_v14 = vmul.f32 %v1996_v16, %v3439_v40  ;;  %1999 = vrsqrt.f32 %v3463_v48  ;;  %v3472_v57 = vadd.f32 1e-05, %v1141_v38  ;;  %vm1259_vm9 = vmor %vm1257_vm3, %vm1258_vm4 }
 0x29b   : > { %v1230_v13 = vsel %vm1229_vm5, %v1990_v23, %v1226_v5  ;;  %v1253_v24 = vmul.f32 %v1994_v10, %v1252_v6  ;;  %vm1238_vm7 = vweird.f32 %v1996_v16  ;;  %v1212_v60 = vmul.f32 %v1998_v44, %v3441_v9 }
 0x29c   : > { %v1525_v53 = vmul.f32 %v1230_v13, %v3066_v51  ;;  %v1526_v31 = vmul.f32 %v1230_v13, %v4327_v22  ;;  %v1210_v34 = vsel %vm1209_vm6, %v1992_v61, %v1206_v27  ;;  %v1233_v7 = vmul.f32 %v1996_v16, %v1232_v14  ;;  %vm1239_vm12 = vmor %vm1237_vm10, %vm1238_vm7 }
 0x29d   : > { %v1521_v18 = vmul.f32 %v1210_v34, %v4328_v11  ;;  %v1522_v21 = vmul.f32 %v1210_v34, %v4329_v63  ;;  %v1254_v38 = vmul.f32 0.5, %v1253_v24  ;;  %v1213_v36 = vmul.f32 %v1998_v44, %v1212_v60  ;;  %v1076_v60 = vpop.xlane.xlu1 %1075 }
 0x29e   : > { %v1595_v23 = vmul.f32 %v3452_v33, %v1525_v53  ;;  %v1596_v30 = vmul.f32 %v3454_v59, %v1526_v31  ;;  %v1234_v5 = vmul.f32 0.5, %v1233_v7  ;;  %vm1218_vm8 = vweird.f32 %v1998_v44  ;;  %v1070_v24 = vpop.xlane.xlu2 %1069  ;;  %v4330_v7 = vld [vmem:[#allocation21_spill] sm:$0xff] }
 0x29f   : > { %v1591_v6 = vmul.f32 %v3452_v33, %v1521_v18  ;;  %v1592_v51 = vmul.f32 %v3454_v59, %v1522_v21  ;;  %v1255_v20 = vsub.f32 1.5, %v1254_v38  ;;  %v1214_v22 = vmul.f32 0.5, %v1213_v36  ;;  %vm1219_vm14 = vmor %vm1217_vm11, %vm1218_vm8 }
 0x2a0   : > { %v3485_v61 = vpop.eup %1999  ;;  %v1665_v11 = vadd.f32 %v3456_v46, %v1595_v23  ;;  %v1666_v63 = vadd.f32 %v3458_v54, %v1596_v30  ;;  %v1235_v34 = vsub.f32 1.5, %v1234_v5  ;;  %2001 = vrsqrt.f32 %v3467_v8 }
 0x2a1   : > { %v1661_v27 = vadd.f32 %v3456_v46, %v1591_v6  ;;  %v1662_v18 = vadd.f32 %v3458_v54, %v1592_v51  ;;  %v1256_v14 = vmul.f32 %v1994_v10, %v1255_v20  ;;  %v1215_v21 = vsub.f32 1.5, %v1214_v22 }
 0x2a2   : > { %v1236_v36 = vmul.f32 %v1996_v16, %v1235_v34  ;;  %v1282_v13 = vmul.f32 %v3485_v61, %v3463_v48  ;;  %1729 = vst [vmem:[%s3303_s28 + $0x20] sm:$0xff] %v1665_v11  ;;  %vm1287_vm13 = vweird.f32 %v3463_v48  ;;  %2003 = vrsqrt.f32 %v3472_v57 }
 0x2a3   : > { %v1260_v53 = vsel %vm1259_vm9, %v1994_v10, %v1256_v14  ;;  %v1216_v20 = vmul.f32 %v1998_v44, %v1215_v21  ;;  %1725 = vst [vmem:[%s3303_s28] sm:$0xff] %v1661_v27  ;;  %v1148_v30 = vmul.f32 %v1076_v60, %v3061_v15  ;;  %vm1288_vm15 = vweird.f32 %v3485_v61  ;;  %v1064_v27 = vpop.xlane.xlu0 %1063 }
 0x2a4   : > { %v1531_v17 = vmul.f32 %v1260_v53, %v3089_v47  ;;  %v1532_v40 = vmul.f32 %v1260_v53, %v3092_v19  ;;  %v1240_v9 = vsel %vm1239_vm12, %v1996_v16, %v1236_v36  ;;  %v1283_v31 = vmul.f32 %v3485_v61, %v1282_v13  ;;  %1726 = vst [vmem:[%s3303_s28 + $0x8] sm:$0xff] %v1662_v18  ;;  %v4331_v16 = vld [vmem:[#allocation35_spill] sm:$0xff]  ;;  %vm1289_vm1 = vmor %vm1287_vm13, %vm1288_vm15 }
 0x2a5   : > { %v1527_v10 = vmul.f32 %v1240_v9, %v3095_v3  ;;  %v1528_v38 = vmul.f32 %v1240_v9, %v4330_v7  ;;  %v1220_v23 = vsel %vm1219_vm14, %v1998_v44, %v1216_v20  ;;  %1730 = vst [vmem:[%s3303_s28 + $0x28] sm:$0xff] %v1666_v63  ;;  %vm1267_vm0 = vweird.f32 %v3467_v8 }
 0x2a6   : > { %v2002_v5 = vpop.eup %2001  ;;  %v1601_v6 = vmul.f32 %v3452_v33, %v1531_v17  ;;  %v1602_v47 = vmul.f32 %v3454_v59, %v1532_v40  ;;  %v1523_v19 = vmul.f32 %v1220_v23, %v3101_v37  ;;  %v1524_v51 = vmul.f32 %v1220_v23, %v4331_v16  ;;  %v1085_v17 = vpop.xlane.xlu1 %1084 }
 0x2a7   : > { %v1597_v22 = vmul.f32 %v3452_v33, %v1527_v10  ;;  %v1598_v11 = vmul.f32 %v3454_v59, %v1528_v38  ;;  %v1284_v3 = vmul.f32 0.5, %v1283_v31  ;;  %v1262_v44 = vmul.f32 %v2002_v5, %v3467_v8 }
 0x2a8   : > { %v1671_v34 = vadd.f32 %v3456_v46, %v1601_v6  ;;  %v1593_v63 = vmul.f32 %v3452_v33, %v1523_v19  ;;  %v1594_v60 = vmul.f32 %v3454_v59, %v1524_v51  ;;  %v2004_v37 = vpop.eup %2003  ;;  %v1672_v40 = vadd.f32 %v3458_v54, %v1602_v47  ;;  %v1079_v47 = vpop.xlane.xlu2 %1078 }
 0x2a9   : > { %v1667_v18 = vadd.f32 %v3456_v46, %v1597_v22  ;;  %v1285_v14 = vsub.f32 1.5, %v1284_v3  ;;  %v1263_v21 = vmul.f32 %v2002_v5, %v1262_v44  ;;  %v1668_v36 = vadd.f32 %v3458_v54, %v1598_v11 }
 0x2aa   : > { %v1663_v13 = vadd.f32 %v3456_v46, %v1593_v63  ;;  %v1664_v53 = vadd.f32 %v3458_v54, %v1594_v60  ;;  %v1242_v20 = vmul.f32 %v2004_v37, %v3472_v57  ;;  %1735 = vst [vmem:[%s3303_s28 + $0x50] sm:$0xff] %v1671_v34  ;;  %v3533_v10 = vadd.f32 1e-05, %v1148_v30 }
 0x2ab   : > { %v1286_v9 = vmul.f32 %v3485_v61, %v1285_v14  ;;  %v1264_v31 = vmul.f32 0.5, %v1263_v21  ;;  %1731 = vst [vmem:[%s3303_s28 + $0x30] sm:$0xff] %v1667_v18  ;;  %v1146_v38 = vmul.f32 %v1070_v24, %v3061_v15  ;;  %v1144_v23 = vmul.f32 %v1064_v27, %v3061_v15  ;;  %v1073_v14 = vpop.xlane.xlu0 %1072 }
 0x2ac   : > { %v1243_v7 = vmul.f32 %v2004_v37, %v1242_v20  ;;  %1727 = vst [vmem:[%s3303_s28 + $0x10] sm:$0xff] %v1663_v13  ;;  %v1151_v6 = vmul.f32 %v1085_v17, %v3061_v15  ;;  %vm1268_vm2 = vweird.f32 %v2002_v5  ;;  %2005 = vrsqrt.f32 %v3533_v10 }
 0x2ad   : > { %v1290_v30 = vsel %vm1289_vm1, %v3485_v61, %v1286_v9  ;;  %v1265_v19 = vsub.f32 1.5, %v1264_v31  ;;  %1728 = vst [vmem:[%s3303_s28 + $0x18] sm:$0xff] %v1664_v53  ;;  %v3549_v24 = vadd.f32 1e-05, %v1146_v38  ;;  %v3552_v11 = vadd.f32 1e-05, %v1144_v23  ;;  %vm1269_vm3 = vmor %vm1267_vm0, %vm1268_vm2 }
 0x2ae   : > { %v1537_v48 = vmul.f32 %v1290_v30, %v3128_v45  ;;  %v1538_v16 = vmul.f32 %v1290_v30, %v3131_v12  ;;  %v1244_v51 = vmul.f32 0.5, %v1243_v7  ;;  %1732 = vst [vmem:[%s3303_s28 + $0x38] sm:$0xff] %v1668_v36  ;;  %v3555_v3 = vadd.f32 1e-05, %v1151_v6 }
 0x2af   : > { %v1266_v22 = vmul.f32 %v2002_v5, %v1265_v19  ;;  %1736 = vst [vmem:[%s3303_s28 + $0x58] sm:$0xff] %v1672_v40  ;;  %v1149_v61 = vmul.f32 %v1079_v47, %v3061_v15  ;;  %2007 = vrsqrt.f32 %v3549_v24  ;;  %vm1248_vm4 = vweird.f32 %v2004_v37 }
 0x2b0   : > { %v1607_v44 = vmul.f32 %v3452_v33, %v1537_v48  ;;  %v1608_v34 = vmul.f32 %v3454_v59, %v1538_v16  ;;  %v1245_v45 = vsub.f32 1.5, %v1244_v51  ;;  %2009 = vrsqrt.f32 %v3552_v11 }
 0x2b1   : > { %v1270_v12 = vsel %vm1269_vm3, %v2002_v5, %v1266_v22  ;;  %vm1247_vm5 = vweird.f32 %v3472_v57  ;;  %2011 = vrsqrt.f32 %v3555_v3  ;;  %v3573_v5 = vadd.f32 1e-05, %v1149_v61  ;;  %v1088_v61 = vpop.xlane.xlu2 %1087 }
 0x2b2   : > { %v1677_v63 = vadd.f32 %v3456_v46, %v1607_v44  ;;  %v1678_v60 = vadd.f32 %v3458_v54, %v1608_v34  ;;  %v1533_v27 = vmul.f32 %v1270_v12, %v3135_v2  ;;  %v1534_v18 = vmul.f32 %v1270_v12, %v3138_v62  ;;  %v3569_v8 = vpop.eup %2005  ;;  %vm1249_vm6 = vmor %vm1247_vm5, %vm1248_vm4 }
 0x2b3   : > { %v1246_v21 = vmul.f32 %v2004_v37, %v1245_v45  ;;  %v1312_v2 = vmul.f32 %v3569_v8, %v3533_v10  ;;  %vm1317_vm7 = vweird.f32 %v3533_v10  ;;  %2013 = vrsqrt.f32 %v3573_v5 }
 0x2b4   : > { %v1603_v36 = vmul.f32 %v3452_v33, %v1533_v27  ;;  %v1604_v13 = vmul.f32 %v3454_v59, %v1534_v18  ;;  %1741 = vst [vmem:[%s3303_s28 + $0x100] sm:$0xff] %v1677_v63  ;;  %v1147_v57 = vmul.f32 %v1073_v14, %v3061_v15  ;;  %vm1297_vm8 = vweird.f32 %v3549_v24  ;;  %v1082_v18 = vpop.xlane.xlu0 %1081 }
 0x2b5   : > { %v1250_v62 = vsel %vm1249_vm6, %v2004_v37, %v1246_v21  ;;  %1742 = vst [vmem:[%s3303_s28 + $0x108] sm:$0xff] %v1678_v60  ;;  %v2008_v53 = vpop.eup %2007  ;;  %v1313_v37 = vmul.f32 %v3569_v8, %v1312_v2  ;;  %vm1318_vm9 = vweird.f32 %v3569_v8  ;;  %vm1277_vm11 = vweird.f32 %v3552_v11 }
 0x2b6   : > { %v1673_v20 = vadd.f32 %v3456_v46, %v1603_v36  ;;  %v1674_v17 = vadd.f32 %v3458_v54, %v1604_v13  ;;  %v1529_v40 = vmul.f32 %v1250_v62, %v3120_v42  ;;  %v1530_v9 = vmul.f32 %v1250_v62, %v3123_v26  ;;  %v3588_v31 = vpop.eup %2009  ;;  %v1094_v26 = vpop.xlane.xlu1 %1093  ;;  %vm1319_vm1 = vmor %vm1317_vm7, %vm1318_vm9 }
 0x2b7   : > { %v1292_v7 = vmul.f32 %v2008_v53, %v3549_v24  ;;  %v3593_v38 = vadd.f32 1e-05, %v1147_v57  ;;  %v1272_v42 = vmul.f32 %v3588_v31, %v3552_v11  ;;  %v3601_v47 = vpop.eup %2011  ;;  %v1314_v30 = vmul.f32 0.5, %v1313_v37 }
 0x2b8   : > { %v1599_v23 = vmul.f32 %v3452_v33, %v1529_v40  ;;  %v1600_v6 = vmul.f32 %v3454_v59, %v1530_v9  ;;  %1737 = vst [vmem:[%s3303_s28 + $0x60] sm:$0xff] %v1673_v20  ;;  %vm1298_vm10 = vweird.f32 %v2008_v53  ;;  %v1342_v22 = vmul.f32 %v3601_v47, %v3555_v3 }
 0x2b9   : > { %v1293_v19 = vmul.f32 %v2008_v53, %v1292_v7  ;;  %1738 = vst [vmem:[%s3303_s28 + $0x68] sm:$0xff] %v1674_v17  ;;  %2015 = vrsqrt.f32 %v3593_v38  ;;  %v1273_v51 = vmul.f32 %v3588_v31, %v1272_v42  ;;  %v3611_v44 = vpop.eup %2013  ;;  %v1315_v34 = vsub.f32 1.5, %v1314_v30  ;;  %vm1299_vm2 = vmor %vm1297_vm8, %vm1298_vm10  ;;  %v1097_v11 = vpop.xlane.xlu2 %1096 }
 0x2ba   : > { %v1669_v48 = vadd.f32 %v3456_v46, %v1599_v23  ;;  %v1670_v16 = vadd.f32 %v3458_v54, %v1600_v6  ;;  %vm1278_vm12 = vweird.f32 %v3588_v31  ;;  %vm1347_vm13 = vweird.f32 %v3555_v3 }
 0x2bb   : > { %v1294_v45 = vmul.f32 0.5, %v1293_v19  ;;  %v1154_v12 = vmul.f32 %v1094_v26, %v3061_v15  ;;  %v1274_v63 = vmul.f32 0.5, %v1273_v51  ;;  %v1343_v60 = vmul.f32 %v3601_v47, %v1342_v22  ;;  %vm1279_vm4 = vmor %vm1277_vm11, %vm1278_vm12 }
 0x2bc   : > { %1733 = vst [vmem:[%s3303_s28 + $0x40] sm:$0xff] %v1669_v48  ;;  %vm1348_vm14 = vweird.f32 %v3601_v47  ;;  %v1322_v27 = vmul.f32 %v3611_v44, %v3573_v5  ;;  %v1316_v14 = vmul.f32 %v3569_v8, %v1315_v34  ;;  %vm1327_vm15 = vweird.f32 %v3573_v5 }
 0x2bd   : > { %v1295_v21 = vsub.f32 1.5, %v1294_v45  ;;  %1734 = vst [vmem:[%s3303_s28 + $0x48] sm:$0xff] %v1670_v16  ;;  %vm1328_vm0 = vweird.f32 %v3611_v44  ;;  %v3625_v36 = vadd.f32 1e-05, %v1154_v12  ;;  %v1275_v13 = vsub.f32 1.5, %v1274_v63  ;;  %vm1349_vm5 = vmor %vm1347_vm13, %vm1348_vm14 }
 0x2be   : > { %v1344_v2 = vmul.f32 0.5, %v1343_v60  ;;  %v1323_v62 = vmul.f32 %v3611_v44, %v1322_v27  ;;  %v3633_v57 = vmul.f32 %v1088_v61, %v3061_v15  ;;  %v1320_v17 = vsel %vm1319_vm1, %v3569_v8, %v1316_v14  ;;  %v1103_v24 = vpop.xlane.xlu1 %1102  ;;  %vm1329_vm6 = vmor %vm1327_vm15, %vm1328_vm0 }
 0x2bf   : > { %v3635_v20 = vpop.eup %2015  ;;  %v1296_v40 = vmul.f32 %v2008_v53, %v1295_v21  ;;  %2017 = vrsqrt.f32 %v3625_v36  ;;  %v3640_v9 = vmul.f32 %v1082_v18, %v3061_v15  ;;  %v1543_v10 = vmul.f32 %v1320_v17, %v3161_v35 }
 0x2c0   : > { %v1544_v37 = vmul.f32 %v1320_v17, %v3164_v39  ;;  %v1276_v7 = vmul.f32 %v3588_v31, %v1275_v13  ;;  %v1345_v23 = vsub.f32 1.5, %v1344_v2  ;;  %v1324_v42 = vmul.f32 0.5, %v1323_v62 }
 0x2c1   : > { %v1300_v6 = vsel %vm1299_vm2, %v2008_v53, %v1296_v40  ;;  %v1302_v8 = vmul.f32 %v3635_v20, %v3593_v38  ;;  %vm1308_vm3 = vweird.f32 %v3635_v20  ;;  %v1613_v26 = vmul.f32 %v3452_v33, %v1543_v10 }
 0x2c2   : > { %v1614_v35 = vmul.f32 %v3454_v59, %v1544_v37  ;;  %v1539_v39 = vmul.f32 %v1300_v6, %v3167_v49  ;;  %v1540_v30 = vmul.f32 %v1300_v6, %v3170_v50  ;;  %v1280_v53 = vsel %vm1279_vm4, %v3588_v31, %v1276_v7 }
 0x2c3   : > { %v1346_v19 = vmul.f32 %v3601_v47, %v1345_v23  ;;  %v1325_v48 = vsub.f32 1.5, %v1324_v42  ;;  %v1303_v16 = vmul.f32 %v3635_v20, %v1302_v8  ;;  %v1683_v51 = vadd.f32 %v3456_v46, %v1613_v26 }
 0x2c4   : > { %v1684_v49 = vadd.f32 %v3458_v54, %v1614_v35  ;;  %v1609_v50 = vmul.f32 %v3452_v33, %v1539_v39  ;;  %v1610_v22 = vmul.f32 %v3454_v59, %v1540_v30  ;;  %v1535_v61 = vmul.f32 %v1280_v53, %v3153_v29 }
 0x2c5   : > { %v3670_v31 = vpop.eup %2017  ;;  %v1536_v34 = vmul.f32 %v1280_v53, %v3156_v52  ;;  %v1350_v45 = vsel %vm1349_vm5, %v3601_v47, %v1346_v19  ;;  %v1326_v12 = vmul.f32 %v3611_v44, %v1325_v48  ;;  %1747 = vst [vmem:[%s3303_s28 + $0x130] sm:$0xff] %v1683_v51  ;;  %v1304_v18 = vmul.f32 0.5, %v1303_v16 }
 0x2c6   : > { %v1679_v63 = vadd.f32 %v3456_v46, %v1609_v50  ;;  %v1680_v60 = vadd.f32 %v3458_v54, %v1610_v22  ;;  %v1549_v3 = vmul.f32 %v1350_v45, %v3194_v0  ;;  %v1550_v27 = vmul.f32 %v1350_v45, %v3197_v55  ;;  %1748 = vst [vmem:[%s3303_s28 + $0x138] sm:$0xff] %v1684_v49  ;;  %v1112_v8 = vpop.xlane.xlu1 %1111 }
 0x2c7   : > { %v1605_v29 = vmul.f32 %v3452_v33, %v1535_v61  ;;  %v1606_v52 = vmul.f32 %v3454_v59, %v1536_v34  ;;  %v1330_v47 = vsel %vm1329_vm6, %v3611_v44, %v1326_v12  ;;  %v1305_v2 = vsub.f32 1.5, %v1304_v18 }
 0x2c8   : > { %1743 = vst [vmem:[%s3303_s28 + $0x110] sm:$0xff] %v1679_v63  ;;  %v1619_v14 = vmul.f32 %v3452_v33, %v1549_v3  ;;  %v1620_v0 = vmul.f32 %v3454_v59, %v1550_v27  ;;  %v1545_v55 = vmul.f32 %v1330_v47, %v3201_v4  ;;  %v1546_v5 = vmul.f32 %v1330_v47, %v3204_v1 }
 0x2c9   : > { %v1675_v21 = vadd.f32 %v3456_v46, %v1605_v29  ;;  %v1676_v13 = vadd.f32 %v3458_v54, %v1606_v52  ;;  %1744 = vst [vmem:[%s3303_s28 + $0x118] sm:$0xff] %v1680_v60  ;;  %v1372_v44 = vmul.f32 %v3670_v31, %v3625_v36  ;;  %v1306_v1 = vmul.f32 %v3635_v20, %v1305_v2 }
 0x2ca   : > { %v1689_v62 = vadd.f32 %v3456_v46, %v1619_v14  ;;  %v1690_v17 = vadd.f32 %v3458_v54, %v1620_v0  ;;  %v1615_v40 = vmul.f32 %v3452_v33, %v1545_v55  ;;  %v1616_v4 = vmul.f32 %v3454_v59, %v1546_v5 }
 0x2cb   : > { %1739 = vst [vmem:[%s3303_s28 + $0x70] sm:$0xff] %v1675_v21  ;;  %vm1307_vm7 = vweird.f32 %v3593_v38  ;;  %v1373_v10 = vmul.f32 %v3670_v31, %v1372_v44  ;;  %v3708_v37 = vadd.f32 1e-05, %v3633_v57  ;;  %v3716_v6 = vadd.f32 1e-05, %v3640_v9  ;;  %v1091_v38 = vpop.xlane.xlu0 %1090  ;;  %v1106_v9 = vpop.xlane.xlu2 %1105 }
 0x2cc   : > { %1740 = vst [vmem:[%s3303_s28 + $0x78] sm:$0xff] %v1676_v13  ;;  %v1685_v7 = vadd.f32 %v3456_v46, %v1615_v40  ;;  %v1686_v23 = vadd.f32 %v3458_v54, %v1616_v4  ;;  %vm1309_vm8 = vmor %vm1307_vm7, %vm1308_vm3  ;;  %v1157_v42 = vmul.f32 %v1103_v24, %v3061_v15  ;;  %vm1378_vm9 = vweird.f32 %v3670_v31 }
 0x2cd   : > { %1753 = vst [vmem:[%s3303_s28 + $0x160] sm:$0xff] %v1689_v62  ;;  %v1310_v57 = vsel %vm1309_vm8, %v3635_v20, %v1306_v1  ;;  %v1374_v26 = vmul.f32 0.5, %v1373_v10  ;;  %2019 = vrsqrt.f32 %v3708_v37  ;;  %v1155_v53 = vmul.f32 %v1097_v11, %v3061_v15 }
 0x2ce   : > { %1754 = vst [vmem:[%s3303_s28 + $0x168] sm:$0xff] %v1690_v17  ;;  %v1541_v35 = vmul.f32 %v1310_v57, %v3186_v58  ;;  %v1542_v39 = vmul.f32 %v1310_v57, %v3189_v28  ;;  %2021 = vrsqrt.f32 %v3716_v6  ;;  %v3728_v24 = vadd.f32 1e-05, %v1157_v42 }
 0x2cf   : > { %1749 = vst [vmem:[%s3303_s28 + $0x140] sm:$0xff] %v1685_v7  ;;  %v1375_v30 = vsub.f32 1.5, %v1374_v26  ;;  %v1153_v20 = vmul.f32 %v1091_v38, %v3061_v15  ;;  %vm1377_vm10 = vweird.f32 %v3625_v36  ;;  %v1160_v28 = vmul.f32 %v1112_v8, %v3061_v15 }
 0x2d0   : > { %1750 = vst [vmem:[%s3303_s28 + $0x148] sm:$0xff] %v1686_v23  ;;  %v1611_v19 = vmul.f32 %v3452_v33, %v1541_v35  ;;  %v1612_v58 = vmul.f32 %v3454_v59, %v1542_v39  ;;  %2023 = vrsqrt.f32 %v3728_v24  ;;  %v3739_v16 = vadd.f32 1e-05, %v1155_v53  ;;  %vm1379_vm11 = vmor %vm1377_vm10, %vm1378_vm9 }
 0x2d1   : > { %v1376_v48 = vmul.f32 %v3670_v31, %v1375_v30  ;;  %v1158_v51 = vmul.f32 %v1106_v9, %v3061_v15  ;;  %v3746_v22 = vadd.f32 1e-05, %v1153_v20  ;;  %v3748_v36 = vadd.f32 1e-05, %v1160_v28 }
 0x2d2   : > { %v1681_v49 = vadd.f32 %v3456_v46, %v1611_v19  ;;  %v1682_v50 = vadd.f32 %v3458_v54, %v1612_v58  ;;  %2025 = vrsqrt.f32 %v3739_v16  ;;  %vm1357_vm12 = vweird.f32 %v3708_v37 }
 0x2d3   : > { %v2020_v11 = vpop.eup %2019  ;;  %v1380_v61 = vsel %vm1379_vm11, %v3670_v31, %v1376_v48  ;;  %2027 = vrsqrt.f32 %v3746_v22  ;;  %v3763_v31 = vadd.f32 1e-05, %v1158_v51  ;;  %vm1337_vm14 = vweird.f32 %v3716_v6  ;;  %v1115_v40 = vpop.xlane.xlu2 %1114 }
 0x2d4   : > { %v3752_v34 = vpop.eup %2021  ;;  %1745 = vst [vmem:[%s3303_s28 + $0x120] sm:$0xff] %v1681_v49  ;;  %v1555_v45 = vmul.f32 %v1380_v61, %v3227_v56  ;;  %v1556_v12 = vmul.f32 %v1380_v61, %v3230_v25  ;;  %v1352_v63 = vmul.f32 %v2020_v11, %v3708_v37  ;;  %2029 = vrsqrt.f32 %v3748_v36  ;;  %v1100_v56 = vpop.xlane.xlu0 %1099 }
 0x2d5   : > { %1746 = vst [vmem:[%s3303_s28 + $0x128] sm:$0xff] %v1682_v50  ;;  %v1332_v60 = vmul.f32 %v3752_v34, %v3716_v6  ;;  %v1121_v25 = vpop.xlane.xlu1 %1120  ;;  %vm1358_vm13 = vweird.f32 %v2020_v11  ;;  %vm1338_vm15 = vweird.f32 %v3752_v34  ;;  %vm1407_vm0 = vweird.f32 %v3728_v24  ;;  %v4332_v6 = vld [vmem:[#allocation20_spill] sm:$0xff] }
 0x2d6   : > { %v1625_v3 = vmul.f32 %v3452_v33, %v1555_v45  ;;  %v1626_v27 = vmul.f32 %v3454_v59, %v1556_v12  ;;  %v1353_v29 = vmul.f32 %v2020_v11, %v1352_v63  ;;  %v2024_v52 = vpop.eup %2023  ;;  %2031 = vrsqrt.f32 %v3763_v31  ;;  %vm1359_vm4 = vmor %vm1357_vm12, %vm1358_vm13 }
 0x2d7   : > { %v1333_v47 = vmul.f32 %v3752_v34, %v1332_v60  ;;  %v1402_v55 = vmul.f32 %v2024_v52, %v3728_v24  ;;  %v1156_v13 = vmul.f32 %v1100_v56, %v3061_v15  ;;  %v1163_v2 = vmul.f32 %v1121_v25, %v3061_v15  ;;  %vm1339_vm6 = vmor %vm1337_vm14, %vm1338_vm15  ;;  %v4334_v25 = vld [vmem:[#allocation24_spill] sm:$0xff] }
 0x2d8   : > { %v1695_v18 = vadd.f32 %v3456_v46, %v1625_v3  ;;  %v1696_v14 = vadd.f32 %v3458_v54, %v1626_v27  ;;  %v1354_v0 = vmul.f32 0.5, %v1353_v29  ;;  %v2026_v5 = vpop.eup %2025  ;;  %vm1408_vm1 = vweird.f32 %v2024_v52  ;;  %v4333_v29 = vld [vmem:[#allocation31_spill] sm:$0xff] }
 0x2d9   : > { %v1334_v21 = vmul.f32 0.5, %v1333_v47  ;;  %v1403_v62 = vmul.f32 %v2024_v52, %v1402_v55  ;;  %v1382_v17 = vmul.f32 %v2026_v5, %v3739_v16  ;;  %vm1387_vm2 = vweird.f32 %v3739_v16  ;;  %v3781_v4 = vpop.eup %2027  ;;  %vm1409_vm9 = vmor %vm1407_vm0, %vm1408_vm1 }
 0x2da   : > { %1759 = vst [vmem:[%s3303_s28 + $0x210] sm:$0xff] %v1695_v18  ;;  %v1355_v44 = vsub.f32 1.5, %v1354_v0  ;;  %vm1388_vm3 = vweird.f32 %v2026_v5  ;;  %v3784_v10 = vadd.f32 1e-05, %v1156_v13  ;;  %v3786_v7 = vadd.f32 1e-05, %v1163_v2  ;;  %v3788_v23 = vpop.eup %2029 }
 0x2db   : > { %1760 = vst [vmem:[%s3303_s28 + $0x218] sm:$0xff] %v1696_v14  ;;  %v1335_v1 = vsub.f32 1.5, %v1334_v21  ;;  %v1404_v38 = vmul.f32 0.5, %v1403_v62  ;;  %v1383_v8 = vmul.f32 %v2026_v5, %v1382_v17  ;;  %v1362_v57 = vmul.f32 %v3781_v4, %v3746_v22  ;;  %vm1389_vm10 = vmor %vm1387_vm2, %vm1388_vm3  ;;  %v4335_v21 = vld [vmem:[#allocation37_spill] sm:$0xff]  ;;  %v4336_v2 = vld [vmem:[#allocation23_spill] sm:$0xff] }
 0x2dc   : > { %v1356_v42 = vmul.f32 %v2020_v11, %v1355_v44  ;;  %vm1368_vm5 = vweird.f32 %v3781_v4  ;;  %v1432_v35 = vmul.f32 %v3788_v23, %v3748_v36  ;;  %v3800_v39 = vmul.f32 %v1115_v40, %v3061_v15  ;;  %v3808_v20 = vpop.eup %2031  ;;  %v1109_v60 = vpop.xlane.xlu0 %1108 }
 0x2dd   : > { %v1336_v26 = vmul.f32 %v3752_v34, %v1335_v1  ;;  %v1405_v30 = vsub.f32 1.5, %v1404_v38  ;;  %v1384_v53 = vmul.f32 0.5, %v1383_v8  ;;  %v1363_v37 = vmul.f32 %v3781_v4, %v1362_v57 }
 0x2de   : > { %v1360_v9 = vsel %vm1359_vm4, %v2020_v11, %v1356_v42  ;;  %vm1367_vm7 = vweird.f32 %v3746_v22  ;;  %v1433_v48 = vmul.f32 %v3788_v23, %v1432_v35  ;;  %vm1437_vm8 = vweird.f32 %v3748_v36  ;;  %v4338_v22 = vld [vmem:[#allocation17_spill] sm:$0xff] }
 0x2df   : > { %v1551_v19 = vmul.f32 %v1360_v9, %v3233_v41  ;;  %v1552_v58 = vmul.f32 %v1360_v9, %v3236_v32  ;;  %v1340_v28 = vsel %vm1339_vm6, %v3752_v34, %v1336_v26  ;;  %v1406_v50 = vmul.f32 %v2024_v52, %v1405_v30  ;;  %vm1369_vm12 = vmor %vm1367_vm7, %vm1368_vm5  ;;  %v4337_v9 = vld [vmem:[#allocation34_spill] sm:$0xff] }
 0x2e0   : > { %v1547_v51 = vmul.f32 %v1340_v28, %v3219_v43  ;;  %v1548_v49 = vmul.f32 %v1340_v28, %v4332_v6  ;;  %v1385_v11 = vsub.f32 1.5, %v1384_v53  ;;  %v1364_v41 = vmul.f32 0.5, %v1363_v37  ;;  %v4339_v28 = vld [vmem:[#allocation16_spill] sm:$0xff] }
 0x2e1   : > { %v1621_v61 = vmul.f32 %v3452_v33, %v1551_v19  ;;  %v1622_v45 = vmul.f32 %v3454_v59, %v1552_v58  ;;  %v1434_v32 = vmul.f32 0.5, %v1433_v48  ;;  %v1410_v12 = vsel %vm1409_vm9, %v2024_v52, %v1406_v50 }
 0x2e2   : > { %v1617_v34 = vmul.f32 %v3452_v33, %v1547_v51  ;;  %v1618_v43 = vmul.f32 %v3454_v59, %v1548_v49  ;;  %v1386_v63 = vmul.f32 %v2026_v5, %v1385_v11  ;;  %v1561_v56 = vmul.f32 %v1410_v12, %v4333_v29  ;;  %v4340_v51 = vld [vmem:[#allocation30_spill] sm:$0xff]  ;;  %v1124_v49 = vpop.xlane.xlu2 %1123 }
 0x2e3   : > { %v1691_v3 = vadd.f32 %v3456_v46, %v1621_v61  ;;  %v1692_v27 = vadd.f32 %v3458_v54, %v1622_v45  ;;  %v1562_v24 = vmul.f32 %v1410_v12, %v4334_v25  ;;  %v1365_v14 = vsub.f32 1.5, %v1364_v41 }
 0x2e4   : > { %v1687_v47 = vadd.f32 %v3456_v46, %v1617_v34  ;;  %v1688_v52 = vadd.f32 %v3458_v54, %v1618_v43  ;;  %v1390_v18 = vsel %vm1389_vm10, %v2026_v5, %v1386_v63  ;;  %v1631_v0 = vmul.f32 %v3452_v33, %v1561_v56  ;;  %v1118_v11 = vpop.xlane.xlu0 %1117  ;;  %v1130_v34 = vpop.xlane.xlu1 %1129  ;;  %v4341_v56 = vld [vmem:[#allocation12_spill] sm:$0xff] }
 0x2e5   : > { %1755 = vst [vmem:[%s3303_s28 + $0x170] sm:$0xff] %v1691_v3  ;;  %v1632_v55 = vmul.f32 %v3454_v59, %v1562_v24  ;;  %v1557_v13 = vmul.f32 %v1390_v18, %v4335_v21  ;;  %v1558_v44 = vmul.f32 %v1390_v18, %v4336_v2  ;;  %v1366_v16 = vmul.f32 %v3781_v4, %v1365_v14  ;;  %v4342_v24 = vld [vmem:[#allocation25_spill] sm:$0xff] }
 0x2e6   : > { %1756 = vst [vmem:[%s3303_s28 + $0x178] sm:$0xff] %v1692_v27  ;;  %v1435_v62 = vsub.f32 1.5, %v1434_v32  ;;  %vm1438_vm11 = vweird.f32 %v3788_v23  ;;  %v1412_v5 = vmul.f32 %v3808_v20, %v3763_v31  ;;  %v1701_v17 = vadd.f32 %v3456_v46, %v1631_v0 }
 0x2e7   : > { %1751 = vst [vmem:[%s3303_s28 + $0x150] sm:$0xff] %v1687_v47  ;;  %v1702_v40 = vadd.f32 %v3458_v54, %v1632_v55  ;;  %v1627_v1 = vmul.f32 %v3452_v33, %v1557_v13  ;;  %v1628_v42 = vmul.f32 %v3454_v59, %v1558_v44  ;;  %v1370_v38 = vsel %vm1369_vm12, %v3781_v4, %v1366_v16  ;;  %vm1439_vm13 = vmor %vm1437_vm8, %vm1438_vm11 }
 0x2e8   : > { %1752 = vst [vmem:[%s3303_s28 + $0x158] sm:$0xff] %v1688_v52  ;;  %v1436_v8 = vmul.f32 %v3788_v23, %v1435_v62  ;;  %v1413_v57 = vmul.f32 %v3808_v20, %v1412_v5  ;;  %2033 = vrsqrt.f32 %v3784_v10  ;;  %v1553_v30 = vmul.f32 %v1370_v38, %v4337_v9 }
 0x2e9   : > { %1765 = vst [vmem:[%s3303_s28 + $0x240] sm:$0xff] %v1701_v17  ;;  %v1697_v26 = vadd.f32 %v3456_v46, %v1627_v1  ;;  %v1698_v35 = vadd.f32 %v3458_v54, %v1628_v42  ;;  %v1554_v53 = vmul.f32 %v1370_v38, %v4338_v22  ;;  %2035 = vrsqrt.f32 %v3786_v7 }
 0x2ea   : > { %1766 = vst [vmem:[%s3303_s28 + $0x248] sm:$0xff] %v1702_v40  ;;  %v1440_v4 = vsel %vm1439_vm13, %v3788_v23, %v1436_v8  ;;  %v1414_v37 = vmul.f32 0.5, %v1413_v57  ;;  %v1623_v19 = vmul.f32 %v3452_v33, %v1553_v30  ;;  %vm1418_vm14 = vweird.f32 %v3808_v20  ;;  %v1133_v42 = vpop.xlane.xlu2 %1132 }
 0x2eb   : > { %1761 = vst [vmem:[%s3303_s28 + $0x220] sm:$0xff] %v1697_v26  ;;  %v1624_v58 = vmul.f32 %v3454_v59, %v1554_v53  ;;  %v1567_v48 = vmul.f32 %v1440_v4, %v4339_v28  ;;  %v1568_v6 = vmul.f32 %v1440_v4, %v4340_v51  ;;  %v3877_v23 = vadd.f32 1e-05, %v3800_v39  ;;  %v4343_v28 = vld [vmem:[#allocation36_spill] sm:$0xff] }
 0x2ec   : > { %1762 = vst [vmem:[%s3303_s28 + $0x228] sm:$0xff] %v1698_v35  ;;  %v1415_v36 = vsub.f32 1.5, %v1414_v37  ;;  %v1159_v50 = vmul.f32 %v1109_v60, %v3061_v15  ;;  %v1693_v61 = vadd.f32 %v3456_v46, %v1623_v19  ;;  %vm1417_vm15 = vweird.f32 %v3763_v31  ;;  %v1127_v57 = vpop.xlane.xlu0 %1126  ;;  %v4344_v51 = vld [vmem:[#allocation32_spill] sm:$0xff] }
 0x2ed   : > { %v1694_v45 = vadd.f32 %v3458_v54, %v1624_v58  ;;  %v1637_v41 = vmul.f32 %v3452_v33, %v1567_v48  ;;  %v1638_v32 = vmul.f32 %v3454_v59, %v1568_v6  ;;  %2037 = vrsqrt.f32 %v3877_v23  ;;  %vm1419_vm0 = vmor %vm1417_vm15, %vm1418_vm14 }
 0x2ee   : > { %v2034_v43 = vpop.eup %2033  ;;  %v1416_v12 = vmul.f32 %v3808_v20, %v1415_v36  ;;  %v3887_v39 = vadd.f32 1e-05, %v1159_v50  ;;  %1757 = vst [vmem:[%s3303_s28 + $0x200] sm:$0xff] %v1693_v61  ;;  %vm1397_vm1 = vweird.f32 %v3784_v10  ;;  %v1166_v31 = vmul.f32 %v1130_v34, %v3061_v15 }
 0x2ef   : > { %v1707_v63 = vadd.f32 %v3456_v46, %v1637_v41  ;;  %v1708_v60 = vadd.f32 %v3458_v54, %v1638_v32  ;;  %v1392_v3 = vmul.f32 %v2034_v43, %v3784_v10  ;;  %v2036_v27 = vpop.eup %2035  ;;  %1758 = vst [vmem:[%s3303_s28 + $0x208] sm:$0xff] %v1694_v45  ;;  %vm1467_vm2 = vweird.f32 %v3786_v7  ;;  %v4345_v32 = vld [vmem:[#allocation11_spill] sm:$0xff] }
 0x2f0   : > { %v1420_v29 = vsel %vm1419_vm0, %v3808_v20, %v1416_v12  ;;  %2039 = vrsqrt.f32 %v3887_v39  ;;  %v1462_v18 = vmul.f32 %v2036_v27, %v3786_v7  ;;  %v3906_v14 = vadd.f32 1e-05, %v1166_v31 }
 0x2f1   : > { %1771 = vst [vmem:[%s3303_s28 + $0x270] sm:$0xff] %v1707_v63  ;;  %v1563_v25 = vmul.f32 %v1420_v29, %v4341_v56  ;;  %v1564_v47 = vmul.f32 %v1420_v29, %v4342_v24  ;;  %v1393_v52 = vmul.f32 %v2034_v43, %v1392_v3  ;;  %v1164_v20 = vmul.f32 %v1124_v49, %v3061_v15 }
 0x2f2   : > { %1772 = vst [vmem:[%s3303_s28 + $0x278] sm:$0xff] %v1708_v60  ;;  %v1162_v0 = vmul.f32 %v1118_v11, %v3061_v15  ;;  %v1463_v2 = vmul.f32 %v2036_v27, %v1462_v18  ;;  %vm1398_vm3 = vweird.f32 %v2034_v43  ;;  %2041 = vrsqrt.f32 %v3906_v14 }
 0x2f3   : > { %v1633_v55 = vmul.f32 %v3452_v33, %v1563_v25  ;;  %v1634_v21 = vmul.f32 %v3454_v59, %v1564_v47  ;;  %v1394_v13 = vmul.f32 0.5, %v1393_v52  ;;  %v3912_v44 = vpop.eup %2037  ;;  %v3915_v16 = vadd.f32 1e-05, %v1164_v20  ;;  %vm1399_vm8 = vmor %vm1397_vm1, %vm1398_vm3 }
 0x2f4   : > { %v3917_v62 = vadd.f32 1e-05, %v1162_v0  ;;  %v1464_v1 = vmul.f32 0.5, %v1463_v2  ;;  %vm1468_vm4 = vweird.f32 %v2036_v27  ;;  %v1442_v8 = vmul.f32 %v3912_v44, %v3877_v23 }
 0x2f5   : > { %v1703_v5 = vadd.f32 %v3456_v46, %v1633_v55  ;;  %v1704_v17 = vadd.f32 %v3458_v54, %v1634_v21  ;;  %v1395_v40 = vsub.f32 1.5, %v1394_v13  ;;  %vm1447_vm5 = vweird.f32 %v3877_v23  ;;  %vm1469_vm10 = vmor %vm1467_vm2, %vm1468_vm4 }
 0x2f6   : > { %v2040_v38 = vpop.eup %2039  ;;  %2043 = vrsqrt.f32 %v3915_v16  ;;  %v1465_v35 = vsub.f32 1.5, %v1464_v1  ;;  %vm1448_vm6 = vweird.f32 %v3912_v44  ;;  %vm1427_vm7 = vweird.f32 %v3887_v39 }
 0x2f7   : > { %1767 = vst [vmem:[%s3303_s28 + $0x250] sm:$0xff] %v1703_v5  ;;  %v1396_v26 = vmul.f32 %v2034_v43, %v1395_v40  ;;  %v1422_v9 = vmul.f32 %v2040_v38, %v3887_v39  ;;  %v1443_v30 = vmul.f32 %v3912_v44, %v1442_v8  ;;  %vm1428_vm9 = vweird.f32 %v2040_v38  ;;  %vm1449_vm14 = vmor %vm1447_vm5, %vm1448_vm6  ;;  %v4347_v5 = vld [vmem:[#allocation18_spill] sm:$0xff]  ;;  %v4348_v40 = vld [vmem:[#allocation29_spill] sm:$0xff] }
 0x2f8   : > { %1768 = vst [vmem:[%s3303_s28 + $0x258] sm:$0xff] %v1704_v17  ;;  %2045 = vrsqrt.f32 %v3917_v62  ;;  %v1167_v22 = vmul.f32 %v1133_v42, %v3061_v15  ;;  %v1466_v4 = vmul.f32 %v2036_v27, %v1465_v35  ;;  %v3937_v19 = vmul.f32 %v1127_v57, %v3061_v15  ;;  %v2042_v58 = vpop.eup %2041  ;;  %vm1429_vm15 = vmor %vm1427_vm7, %vm1428_vm9  ;;  %v4349_v42 = vld [vmem:[#allocation22_spill] sm:$0xff]  ;;  %v4350_v57 = vld [vmem:[#allocation28_spill] sm:$0xff] }
 0x2f9   : > { %v1400_v53 = vsel %vm1399_vm8, %v2034_v43, %v1396_v26  ;;  %v1423_v37 = vmul.f32 %v2040_v38, %v1422_v9  ;;  %v1444_v10 = vmul.f32 0.5, %v1443_v30  ;;  %v1492_v11 = vmul.f32 %v2042_v58, %v3906_v14  ;;  %v4346_v43 = vld [vmem:[#allocation19_spill] sm:$0xff] }
 0x2fa   : > { %v1559_v48 = vmul.f32 %v1400_v53, %v4343_v28  ;;  %v1560_v6 = vmul.f32 %v1400_v53, %v4344_v51  ;;  %v3944_v49 = vadd.f32 1e-05, %v1167_v22  ;;  %v1470_v36 = vsel %vm1469_vm10, %v2036_v27, %v1466_v4 }
 0x2fb   : > { %v1424_v50 = vmul.f32 0.5, %v1423_v37  ;;  %vm1497_vm11 = vweird.f32 %v3906_v14  ;;  %vm1498_vm12 = vweird.f32 %v2042_v58  ;;  %v1573_v34 = vmul.f32 %v1470_v36, %v4345_v32  ;;  %v1136_v14 = vpop.xlane.xlu0 %1135 }
 0x2fc   : > { %v2044_v61 = vpop.eup %2043  ;;  %v1629_v45 = vmul.f32 %v3452_v33, %v1559_v48  ;;  %v1630_v41 = vmul.f32 %v3454_v59, %v1560_v6  ;;  %v1574_v7 = vmul.f32 %v1470_v36, %v4346_v43  ;;  %v1445_v12 = vsub.f32 1.5, %v1444_v10  ;;  %vm1499_vm2 = vmor %vm1497_vm11, %vm1498_vm12  ;;  %v4352_v36 = vld [vmem:[#allocation39_spill] sm:$0xff] }
 0x2fd   : > { %v1425_v63 = vsub.f32 1.5, %v1424_v50  ;;  %v1493_v60 = vmul.f32 %v2042_v58, %v1492_v11  ;;  %v1472_v3 = vmul.f32 %v2044_v61, %v3915_v16  ;;  %vm1477_vm13 = vweird.f32 %v3915_v16 }
 0x2fe   : > { %v3954_v27 = vpop.eup %2045  ;;  %v1699_v29 = vadd.f32 %v3456_v46, %v1629_v45  ;;  %v1700_v31 = vadd.f32 %v3458_v54, %v1630_v41  ;;  %v1643_v56 = vmul.f32 %v3452_v33, %v1573_v34  ;;  %v1644_v25 = vmul.f32 %v3454_v59, %v1574_v7  ;;  %v4353_v41 = vld [vmem:[#allocation40_spill] sm:$0xff]  ;;  %v4354_v34 = vld [vmem:[#allocation41_spill] sm:$0xff] }
 0x2ff   : > { %v1446_v24 = vmul.f32 %v3912_v44, %v1445_v12  ;;  %v1426_v47 = vmul.f32 %v2040_v38, %v1425_v63  ;;  %v1494_v52 = vmul.f32 0.5, %v1493_v60  ;;  %v1473_v18 = vmul.f32 %v2044_v61, %v1472_v3 }
 0x300   : > { %1763 = vst [vmem:[%s3303_s28 + $0x230] sm:$0xff] %v1699_v29  ;;  %v1713_v20 = vadd.f32 %v3456_v46, %v1643_v56  ;;  %v1714_v0 = vadd.f32 %v3458_v54, %v1644_v25  ;;  %vm1478_vm0 = vweird.f32 %v2044_v61  ;;  %v1452_v55 = vmul.f32 %v3954_v27, %v3917_v62 }
 0x301   : > { %1764 = vst [vmem:[%s3303_s28 + $0x238] sm:$0xff] %v1700_v31  ;;  %v1450_v23 = vsel %vm1449_vm14, %v3912_v44, %v1446_v24  ;;  %v1430_v21 = vsel %vm1429_vm15, %v2040_v38, %v1426_v47  ;;  %v1495_v13 = vsub.f32 1.5, %v1494_v52  ;;  %v1474_v2 = vmul.f32 0.5, %v1473_v18  ;;  %vm1479_vm3 = vmor %vm1477_vm13, %vm1478_vm0  ;;  %v4355_v24 = vld [vmem:[#allocation33_spill] sm:$0xff]  ;;  %v4356_v52 = vld [vmem:[#allocation15_spill] sm:$0xff] }
 0x302   : > { %1777 = vst [vmem:[%s3303_s28 + $0x320] sm:$0xff] %v1713_v20  ;;  %v1569_v17 = vmul.f32 %v1450_v23, %v4347_v5  ;;  %v1570_v1 = vmul.f32 %v1450_v23, %v4348_v40  ;;  %v1565_v8 = vmul.f32 %v1430_v21, %v4349_v42  ;;  %v1566_v39 = vmul.f32 %v1430_v21, %v4350_v57 }
 0x303   : > { %1778 = vst [vmem:[%s3303_s28 + $0x328] sm:$0xff] %v1714_v0  ;;  %v1496_v26 = vmul.f32 %v2042_v58, %v1495_v13  ;;  %v1475_v35 = vsub.f32 1.5, %v1474_v2  ;;  %v1453_v9 = vmul.f32 %v3954_v27, %v1452_v55  ;;  %vm1458_vm1 = vweird.f32 %v3954_v27 }
 0x304   : > { %v1639_v44 = vmul.f32 %v3452_v33, %v1569_v17  ;;  %v1640_v38 = vmul.f32 %v3454_v59, %v1570_v1  ;;  %v1635_v30 = vmul.f32 %v3452_v33, %v1565_v8  ;;  %v1636_v22 = vmul.f32 %v3454_v59, %v1566_v39 }
 0x305   : > { %v1500_v53 = vsel %vm1499_vm2, %v2042_v58, %v1496_v26  ;;  %v1476_v4 = vmul.f32 %v2044_v61, %v1475_v35  ;;  %v1454_v37 = vmul.f32 0.5, %v1453_v9  ;;  %2047 = vrsqrt.f32 %v3944_v49  ;;  %v4351_v58 = vld [vmem:[#allocation38_spill] sm:$0xff]  ;;  %v4357_v9 = vld [vmem:[#allocation44_spill] sm:$0xff] }
 0x306   : > { %v1709_v28 = vadd.f32 %v3456_v46, %v1639_v44  ;;  %v1710_v48 = vadd.f32 %v3458_v54, %v1640_v38  ;;  %v1705_v51 = vadd.f32 %v3456_v46, %v1635_v30  ;;  %v1706_v6 = vadd.f32 %v3458_v54, %v1636_v22  ;;  %v4358_v38 = vld [vmem:[#allocation45_spill] sm:$0xff] }
 0x307   : > { %v1579_v10 = vmul.f32 %v1500_v53, %v4351_v58  ;;  %v1580_v50 = vmul.f32 %v1500_v53, %v4352_v36  ;;  %v1480_v11 = vsel %vm1479_vm3, %v2044_v61, %v1476_v4  ;;  %v1455_v45 = vsub.f32 1.5, %v1454_v37  ;;  %v4360_v58 = vld [vmem:[#allocation43_spill] sm:$0xff] }
 0x308   : > { %1773 = vst [vmem:[%s3303_s28 + $0x300] sm:$0xff] %v1709_v28  ;;  %v1575_v32 = vmul.f32 %v1480_v11, %v4353_v41  ;;  %v1576_v43 = vmul.f32 %v1480_v11, %v4354_v34  ;;  %vm1457_vm4 = vweird.f32 %v3917_v62  ;;  %v1197_v7 = vadd.f32 1e-05, %v3937_v19  ;;  %v4361_v34 = vld [vmem:[#allocation46_spill] sm:$0xff] }
 0x309   : > { %1774 = vst [vmem:[%s3303_s28 + $0x308] sm:$0xff] %v1710_v48  ;;  %v1649_v16 = vmul.f32 %v3452_v33, %v1579_v10  ;;  %v1650_v12 = vmul.f32 %v3454_v59, %v1580_v50  ;;  %v1456_v63 = vmul.f32 %v3954_v27, %v1455_v45  ;;  %v1168_v61 = vmul.f32 %v1136_v14, %v3061_v15  ;;  %vm1459_vm5 = vmor %vm1457_vm4, %vm1458_vm1 }
 0x30a   : > { %1769 = vst [vmem:[%s3303_s28 + $0x260] sm:$0xff] %v1705_v51  ;;  %v1645_v60 = vmul.f32 %v3452_v33, %v1575_v32  ;;  %v1646_v3 = vmul.f32 %v3454_v59, %v1576_v43  ;;  %2049 = vrsqrt.f32 %v1197_v7  ;;  %vm1507_vm7 = vweird.f32 %v3944_v49 }
 0x30b   : > { %v2048_v62 = vpop.eup %2047  ;;  %1770 = vst [vmem:[%s3303_s28 + $0x268] sm:$0xff] %v1706_v6  ;;  %v1719_v19 = vadd.f32 %v3456_v46, %v1649_v16  ;;  %v1720_v29 = vadd.f32 %v3458_v54, %v1650_v12  ;;  %v1460_v15 = vsel %vm1459_vm5, %v3954_v27, %v1456_v63  ;;  %v1200_v31 = vadd.f32 1e-05, %v1168_v61  ;;  %v4359_v6 = vld [vmem:[#allocation42_spill] sm:$0xff] }
 0x30c   : > { %v1715_v56 = vadd.f32 %v3456_v46, %v1645_v60  ;;  %v1716_v25 = vadd.f32 %v3458_v54, %v1646_v3  ;;  %v1571_v47 = vmul.f32 %v1460_v15, %v4355_v24  ;;  %v1572_v18 = vmul.f32 %v1460_v15, %v4356_v52 }
 0x30d   : > { %1783 = vst [vmem:[%s3303_s28 + $0x350] sm:$0xff] %v1719_v19  ;;  %v1502_v20 = vmul.f32 %v2048_v62, %v3944_v49  ;;  %2051 = vrsqrt.f32 %v1200_v31  ;;  %vm1508_vm6 = vweird.f32 %v2048_v62  ;;  %vm1487_vm10 = vweird.f32 %v1197_v7 }
 0x30e   : > { %1784 = vst [vmem:[%s3303_s28 + $0x358] sm:$0xff] %v1720_v29  ;;  %v1641_v0 = vmul.f32 %v3452_v33, %v1571_v47  ;;  %v1642_v27 = vmul.f32 %v3454_v59, %v1572_v18  ;;  %vm1509_vm8 = vmor %vm1507_vm7, %vm1508_vm6  ;;  %vm1517_vm13 = vweird.f32 %v1200_v31 }
 0x30f   : > { %1779 = vst [vmem:[%s3303_s28 + $0x330] sm:$0xff] %v1715_v56  ;;  %v1503_v55 = vmul.f32 %v2048_v62, %v1502_v20 }
 0x310   : > { %v2050_v23 = vpop.eup %2049  ;;  %1780 = vst [vmem:[%s3303_s28 + $0x338] sm:$0xff] %v1716_v25  ;;  %v1711_v21 = vadd.f32 %v3456_v46, %v1641_v0  ;;  %v1712_v13 = vadd.f32 %v3458_v54, %v1642_v27 }
 0x311   : > { %v1504_v2 = vmul.f32 0.5, %v1503_v55  ;;  %v1482_v5 = vmul.f32 %v2050_v23, %v1197_v7  ;;  %vm1488_vm9 = vweird.f32 %v2050_v23  ;;  %v4362_v7 = vld [vmem:[#allocation14_spill] sm:$0xff] }
 0x312   : > { %1775 = vst [vmem:[%s3303_s28 + $0x310] sm:$0xff] %v1711_v21  ;;  %vm1489_vm11 = vmor %vm1487_vm10, %vm1488_vm9 }
 0x313   : > { %v2052_v17 = vpop.eup %2051  ;;  %1776 = vst [vmem:[%s3303_s28 + $0x318] sm:$0xff] %v1712_v13  ;;  %v1505_v40 = vsub.f32 1.5, %v1504_v2  ;;  %v1483_v1 = vmul.f32 %v2050_v23, %v1482_v5 }
 0x314   : > { %v1512_v42 = vmul.f32 %v2052_v17, %v1200_v31  ;;  %vm1518_vm12 = vweird.f32 %v2052_v17 }
 0x315   : > { %v1506_v8 = vmul.f32 %v2048_v62, %v1505_v40  ;;  %v1484_v57 = vmul.f32 0.5, %v1483_v1  ;;  %vm1519_vm14 = vmor %vm1517_vm13, %vm1518_vm12 }
 0x316   : > { %v1513_v39 = vmul.f32 %v2052_v17, %v1512_v42 }
 0x317   : > { %v1510_v26 = vsel %vm1509_vm8, %v2048_v62, %v1506_v8  ;;  %v1485_v35 = vsub.f32 1.5, %v1484_v57 }
 0x318   : > { %v1581_v44 = vmul.f32 %v1510_v26, %v4357_v9  ;;  %v1582_v30 = vmul.f32 %v1510_v26, %v4358_v38  ;;  %v1514_v22 = vmul.f32 0.5, %v1513_v39 }
 0x319   : > { %v1486_v53 = vmul.f32 %v2050_v23, %v1485_v35 }
 0x31a   : > { %v1651_v4 = vmul.f32 %v3452_v33, %v1581_v44  ;;  %v1652_v37 = vmul.f32 %v3454_v59, %v1582_v30  ;;  %v1515_v49 = vsub.f32 1.5, %v1514_v22 }
 0x31b   : > { %v1490_v28 = vsel %vm1489_vm11, %v2050_v23, %v1486_v53 }
 0x31c   : > { %v1721_v48 = vadd.f32 %v3456_v46, %v1651_v4  ;;  %v1722_v51 = vadd.f32 %v3458_v54, %v1652_v37  ;;  %v1577_v14 = vmul.f32 %v1490_v28, %v4359_v6  ;;  %v1578_v10 = vmul.f32 %v1490_v28, %v4360_v58 }
 0x31d   : > { %v1516_v36 = vmul.f32 %v2052_v17, %v1515_v49 }
 0x31e   : > { %1785 = vst [vmem:[%s3303_s28 + $0x360] sm:$0xff] %v1721_v48  ;;  %v1647_v50 = vmul.f32 %v3452_v33, %v1577_v14  ;;  %v1648_v11 = vmul.f32 %v3454_v59, %v1578_v10 }
 0x31f   : > { %1786 = vst [vmem:[%s3303_s28 + $0x368] sm:$0xff] %v1722_v51  ;;  %v1520_v45 = vsel %vm1519_vm14, %v2052_v17, %v1516_v36 }
 0x320   : > { %v1717_v41 = vadd.f32 %v3456_v46, %v1647_v50  ;;  %v1718_v32 = vadd.f32 %v3458_v54, %v1648_v11  ;;  %v1583_v43 = vmul.f32 %v1520_v45, %v4361_v34  ;;  %v1584_v16 = vmul.f32 %v1520_v45, %v4362_v7 }
 0x322   : > { %1781 = vst [vmem:[%s3303_s28 + $0x340] sm:$0xff] %v1717_v41  ;;  %v1653_v12 = vmul.f32 %v3452_v33, %v1583_v43  ;;  %v1654_v63 = vmul.f32 %v3454_v59, %v1584_v16 }
 0x323   : > { %1782 = vst [vmem:[%s3303_s28 + $0x348] sm:$0xff] %v1718_v32 }
 0x324   : > { %v1723_v61 = vadd.f32 %v3456_v46, %v1653_v12  ;;  %v1724_v60 = vadd.f32 %v3458_v54, %v1654_v63 }
 0x326   : > { %1787 = vst [vmem:[%s3303_s28 + $0x370] sm:$0xff] %v1723_v61 }
 0x327   : > { %1788 = vst [vmem:[%s3303_s28 + $0x378] sm:$0xff] %v1724_v60 }
 0x328   : > { %2155 = dma.done.wait [#allocation2], 8192 }
 0x329   : > { %2156 = vsyncadd [#allocation2], 4294959104  ;;  %s1921_s20 = sshll.u32 %s2242_s25, 10  ;;  %s1808_s14 = sshll.u32 %s3303_s28, 4  ;;  %s1809_s14 = int_to_ptr.vmem [resolvable:$true] %s1808_s14 }
 0x32a   : > { %s1807_s7 = scalar_lea.hbm %s4099_s6, %s1921_s20  ;;  %s1795_s8 = scalar_lea.sflag [#allocation5], %s2307_s18 }
 0x32b   : > { %s1810_s15 = sshll.u32 %s1807_s7, 4  ;;  %s2127_s25 = scalar_lea.hbm %s4099_s6, 2048  ;;  %s1811_s15 = int_to_ptr.hbm [resolvable:$true] %s1810_s15 }
 0x32c   : > { %s2121_s11 = sshra.s32 %s1811_s15, 4  ;;  %s2122_s11 = int_to_ptr.hbm [resolvable:$true] %s2121_s11 }
 0x32d   : > { %s2123_s16 = scalar_lea.hbm %s2122_s11, 1024  ;;  %p2128_p5 = scmp.lt.s32.totalorder %s2122_s11, %s4099_s6 }
 0x32e   : > { %p2124_p3 = scmp.ne.s32.totalorder %s2122_s11, %s2123_s16  ;;  %p2129_p8 = scmp.lt.s32.totalorder %s2127_s25, %s2123_s16 }
 0x330   : > { %p2125_p4 = pnand %p2124_p3, %p2271_p11  ;;  %p2130_p10 = por %p2129_p8, %p2128_p5 }
 0x332   : > { %p2126_p7 = pneg %p2125_p4 }
 0x334   : > { %p2131_p2 = pnand %p2130_p10, %p2126_p7 }
 0x336   : > { %2134 = shalt.err (!%p2131_p2)
}
 0x337   : > { %s2184_s18 = smov 256   ;;  %s2185_s28 = smov 16  }
 0x338   : > { %1924 = dma.vmem_to_hbm [thread:$0]  (%p2271_p11), %s1809_s14, 16384, %s1811_s15, %s1795_s8, %s2184_s18, %s2184_s18, %s2185_s28  }
 0x339 PF: > { %s1825_s20 = sand.u32 1, %s2163_s21   ;;  %p4363_p6 = scmp.ge.s32.totalorder %s2175_s24, 2 }
 0x33a   : > { %s1826_s26 = scalar_lea.sflag [#allocation5], %s1825_s20 }
 0x33b   : > { %p1931_p9 = pnand %p4363_p6, %p2275_p12 }
 0x33d   : > { %p1932_p13 = pneg %p1931_p9 }
 0x33f   : > { %2158 = dma.done.wait (%p1932_p13), %s1826_s26, 16384  }
 0x340   : > { %2160 = vsyncadd (%p1932_p13), %s1826_s26, 4294950912  ;;  %p19_p0 = scmp.ge.s32.totalorder %s2246_s27, 4   ;;  %s4364_s21 = smov %s2167_s22 }
 0x341   : > { %s4365_s22 = smov %s2171_s23  ;;  %s4366_s23 = smov %s2258_s30 }
 0x342   : > { %s4367_s24 = smov %s2246_s27  ;;  %21 = sbr.rel (!%p19_p0) target bundleno = 5 (0x5), region = 87 }
 0x347   :  { %1832 = vsyncpa [#allocation4], 1 }
 0x348   :  { %1834 = vsyncpa [#allocation4 + $0x1], 1 }
 0x349   :  { %1835 = vsyncpa [#allocation5], 1 }
 0x34a   :  { %1837 = vsyncpa [#allocation5 + $0x1], 1 }
 0x34b   :  { %1838 = vsyncmov [#allocation2] }
 0x34e   :  { %s1839_s24 = vpop.sfrf %1838 }
 0x34f   :  { %p1915_p11 = scmp.ne.s32.totalorder %s1839_s24, 0 }
 0x351   :  { %1843 = shalt.err (%p1915_p11)  }

</bundles_post_ra>
